<compile_context>
chip_gen: v5e
topology: v5e:2x2
jax: 0.10.0
libtpu: 0.0.40
codegen_flags: <defaults>
</compile_context>

<pallas_src>
import functools

import jax
import jax.numpy as jnp
from jax.experimental import pallas as pl
from jax.experimental.pallas import tpu as pltpu

KH = KW = 3          # mask_size
NUM_BINS = 4         # num_bins
HIST_EPS = 1e-5      # torch.tensor(10e-6) used by HistogramLayer.constrain_bins


@functools.lru_cache(maxsize=None)
def _roll_mode():
    """Probe pltpu.roll once: direction convention ('np' == jnp.roll semantics,
    'rev' == opposite) or 'slice' if lane rolls do not lower at this shape."""
    try:
        def probe(x_ref, o_ref):
            o_ref[...] = pltpu.roll(x_ref[...], 17, axis=1)
        x = jnp.tile(jnp.arange(256, dtype=jnp.float32)[None, :], (16, 1))
        y = pl.pallas_call(
            probe, out_shape=jax.ShapeDtypeStruct((16, 256), jnp.float32))(x)
        v = int(jax.device_get(y[0, 0]))
        if v == (0 - 17) % 256:      # out[i] = x[i - shift]  (jnp.roll)
            return "np"
        if v == (0 + 17) % 256:      # out[i] = x[i + shift]
            return "rev"
    except Exception:
        pass
    return "slice"


def _shift_left(a, off, hw, mode):
    """out[:, i] = a[:, i + off] for i < hw - off.  Tail lanes are don't-care:
    they only ever land on masked (invalid) output positions."""
    if off == 0:
        return a
    if mode == "np":
        return pltpu.roll(a, hw - off, axis=1)
    if mode == "rev":
        return pltpu.roll(a, off, axis=1)
    return jnp.concatenate(
        [a[:, off:], jnp.zeros((a.shape[0], off), a.dtype)], axis=1)


def _shift_right(a, off, hw, mode):
    """out[:, i] = a[:, i - off] for i >= off, zeros below.  With the roll path
    the wrapped front lanes come from a's tail, which the caller guarantees to
    be zero (masked edge responses)."""
    if off == 0:
        return a
    if mode == "np":
        return pltpu.roll(a, off, axis=1)
    if mode == "rev":
        return pltpu.roll(a, hw - off, axis=1)
    return jnp.concatenate(
        [jnp.zeros((a.shape[0], off), a.dtype), a[:, :hw - off]], axis=1)


def _nehd_kernel(x_ref, ew_ref, nw_ref, cen_ref, wid_ref, m_ref, out_ref,
                 *, C, B, H, W, roll_mode):
    # x_ref  : (1, C, H*W)      one image, flattened spatial on the lane axis
    # ew_ref : (9, C*B, 1)      edge weights, tap-major
    # nw_ref : (9, C*B, 1)      no-edge weights, tap-major
    # cen_ref: (K, 1)           histogram centers (edge channels then no-edge)
    # wid_ref: (K, 1)           histogram widths
    # m_ref  : (1, H*W)         0/1 validity of flattened conv-output positions
    # out_ref: (1, 1, K)        pooled histogram features for this image
    CB = C * B
    HW = H * W
    G = B + 1
    Ho, Wo = H - (KH - 1), W - (KW - 1)
    pad = W + 1
    taps = [(t, (t // KW) * W + (t % KW)) for t in range(KH * KW)]

    x2 = x_ref[0]                       # (C, HW)
    mask = m_ref[...]                   # (1, HW)

    # Replicate each input channel across its B bins (in-register; x ships
    # un-repeated through HBM/VMEM).
    xr = jnp.concatenate(
        [jnp.broadcast_to(x2[c:c + 1, :], (B, HW)) for c in range(C)], axis=0)

    # ---- edge_responses: grouped VALID 3x3 as 9 lane-shifted MACs ------------
    er = jnp.zeros((CB, HW), jnp.float32)
    for t, off in taps:
        er = er + ew_ref[t] * _shift_left(xr, off, HW, roll_mode)
    er = er * mask                      # zero row-wrapped / tail (invalid) lanes

    # ---- 'same' halo: masked er rolled by W+1 sits exactly inside a zero -----
    # ---- border on the (H, W) grid (no VMEM scratch round-trip) --------------
    er_pad = _shift_right(er, pad, HW, roll_mode)

    # ---- no_edge_conv: grouped SAME 3x3 over the B bins + sigmoid ------------
    acc = jnp.zeros((CB, HW), jnp.float32)
    for t, off in taps:
        acc = acc + nw_ref[t] * _shift_left(er_pad, off, HW, roll_mode)
    ne = jax.nn.sigmoid(jnp.concatenate(
        [jnp.sum(acc[c * B:(c + 1) * B, :], axis=0, keepdims=True)
         for c in range(C)], axis=0))   # (C, HW)

    # ---- histogram RBF on the concatenated [edge | no-edge] channels ---------
    feats = jnp.concatenate([er, ne], axis=0)                       # (K, HW)
    y = jnp.exp(-jnp.square(wid_ref[...] * (feats + cen_ref[...])))

    # ---- constrain_bins over groups of (B+1) channels + masked GAP -----------
    # (invalid lanes hold finite garbage; they are excluded by mask_scaled)
    mask_scaled = mask * (1.0 / float(Ho * Wo))
    pooled = []
    for g in range(C):                  # K // (B+1) == C groups
        yg = y[g * G:(g + 1) * G, :]                                # (G, HW)
        denom = jnp.sum(yg, axis=0, keepdims=True) + HIST_EPS       # (1, HW)
        invw = pl.reciprocal(denom, approx=True) * mask_scaled      # EUP recip
        pooled.append(jnp.sum(yg * invw, axis=1))                   # (G,)
    out_ref[0, 0, :] = jnp.concatenate(pooled, axis=0)              # (K,)


def nehd_forward(x, edge_w, noedge_w, centers, widths):
    """x: (N,C,H,W) f32; edge_w,noedge_w: (C,B,3,3); centers,widths: (C*(B+1),).
    Returns (N, C*(B+1), 1, 1) like the PyTorch module."""
    N, C, H, W = x.shape
    B = edge_w.shape[1]
    K = C * (B + 1)
    CB = C * B
    HW = H * W
    L = HW - (KH - 1) * W - (KW - 1)    # flattened conv-output positions
    Wo = W - (KW - 1)

    roll_mode = _roll_mode()

    x_flat = x.astype(jnp.float32).reshape(N, C, HW)
    # Tap-major compact weights matched to the (C*B, HW) in-kernel layout.
    ew = edge_w.astype(jnp.float32).transpose(2, 3, 0, 1).reshape(KH * KW, CB, 1)
    nw = noedge_w.astype(jnp.float32).transpose(2, 3, 0, 1).reshape(KH * KW, CB, 1)
    cen = centers.astype(jnp.float32).reshape(K, 1)
    wid = widths.astype(jnp.float32).reshape(K, 1)

    # 0/1 validity of each flattened conv-output position (row-wrap / tail mask).
    p = jnp.arange(HW, dtype=jnp.int32)
    mask = ((p < L) & ((p % W) < Wo)).astype(jnp.float32)[None, :]  # (1, HW)

    out = pl.pallas_call(
        functools.partial(_nehd_kernel, C=C, B=B, H=H, W=W, roll_mode=roll_mode),
        out_shape=jax.ShapeDtypeStruct((N, 1, K), jnp.float32),
        grid_spec=pltpu.PrefetchScalarGridSpec(
            num_scalar_prefetch=0,
            grid=(N,),
            in_specs=[
                pl.BlockSpec((1, C, HW), lambda n: (n, 0, 0)),
                pl.BlockSpec((KH * KW, CB, 1), lambda n: (0, 0, 0)),
                pl.BlockSpec((KH * KW, CB, 1), lambda n: (0, 0, 0)),
                pl.BlockSpec((K, 1), lambda n: (0, 0)),
                pl.BlockSpec((K, 1), lambda n: (0, 0)),
                pl.BlockSpec((1, HW), lambda n: (0, 0)),
            ],
            out_specs=pl.BlockSpec((1, 1, K), lambda n: (n, 0, 0)),
        ),
        compiler_params=pltpu.CompilerParams(
            dimension_semantics=("parallel",),      # v7x: one image per TC
            vmem_limit_bytes=32 * 1024 * 1024),     # well under v7x's 64 MiB
    )(x_flat, ew, nw, cen, wid, mask)
    return out.reshape(N, K, 1, 1)


def nehd_reference(x, edge_w, noedge_w, centers, widths):
    """Pure-JAX reference mirroring the PyTorch forward (for validation)."""
    N, C, H, W = x.shape
    B = edge_w.shape[1]
    K = C * (B + 1)
    dn = ('NCHW', 'OIHW', 'NCHW')
    er = jax.lax.conv_general_dilated(
        x, edge_w.reshape(C * B, 1, KH, KW), (1, 1), 'VALID',
        dimension_numbers=dn, feature_group_count=C)
    ne = jax.lax.conv_general_dilated(
        er, noedge_w, (1, 1), 'SAME',
        dimension_numbers=dn, feature_group_count=C)
    ne = jax.nn.sigmoid(ne)
    feats = jnp.concatenate([er, ne], axis=1)
    y = jnp.exp(-jnp.square(widths.reshape(1, K, 1, 1) *
                            (feats + centers.reshape(1, K, 1, 1))))
    yg = y.reshape(N, C, B + 1, y.shape[2], y.shape[3])
    yg = yg / (jnp.sum(yg, axis=2, keepdims=True) + HIST_EPS)
    y = yg.reshape(N, K, y.shape[2], y.shape[3])
    return jnp.mean(y, axis=(2, 3), keepdims=True)


if __name__ == "__main__":
    key = jax.random.PRNGKey(0)
    k_x, k_nw = jax.random.split(key)

    N, C, Hh, Ww = 2, 4, 16, 16
    B = NUM_BINS
    K = C * (B + 1)

    # EHD_init: directional (Sobel-style) masks for 0/45/90/135 degrees.
    # TODO(synk): EHD_Layer.Generate_masks is external; deterministic Sobel-style
    # masks are used as the init instead.
    masks = jnp.array([
        [[1., 2., 1.], [0., 0., 0.], [-1., -2., -1.]],
        [[2., 1., 0.], [1., 0., -1.], [0., -1., -2.]],
        [[1., 0., -1.], [2., 0., -2.], [1., 0., -1.]],
        [[0., 1., 2.], [-1., 0., 1.], [-2., -1., 0.]],
    ], dtype=jnp.float32)                               # (B, 3, 3)
    edge_w = jnp.tile(masks[None], (C, 1, 1, 1))        # (C, B, 3, 3)

    # bin_init = sum(2 * topk(masks[0].flatten(), mask_size)[0])
    bin_init = 2.0 * jnp.sum(jax.lax.top_k(masks[0].reshape(-1), KH)[0])
    centers = jnp.full((K,), -bin_init, dtype=jnp.float32)  # bin_centers_conv.bias
    widths = jnp.ones((K,), dtype=jnp.float32)              # bin_widths_conv.weight

    # no_edge_conv weight (learn_no_edge=True): deterministic stand-in for
    # PyTorch's default Conv2d init (uniform +- 1/sqrt(fan_in)).
    lim = 1.0 / float(jnp.sqrt(jnp.float32(B * KH * KW)))
    noedge_w = jax.random.uniform(k_nw, (C, B, KH, KW), jnp.float32, -lim, lim)

    x = 2.0 * jax.random.uniform(k_x, (N, C, Hh, Ww), jnp.float32)

    out = nehd_forward(x, edge_w, noedge_w, centers, widths)
    out = jax.block_until_ready(out)

    ref = nehd_reference(x, edge_w, noedge_w, centers, widths)
    assert out.shape == (N, K, 1, 1)
    # Tolerance accommodates the EUP approximate reciprocal (<= ~2^-12 relative)
    # used for the group denominators; structural errors would be O(0.1-1).
    assert jnp.allclose(out, ref, atol=2e-3, rtol=2e-3), \
        float(jnp.max(jnp.abs(out - ref)))
    print("KERNEL_OK")
</pallas_src>

<mosaic_0001>
module attributes {stable_mosaic.version = 11 : i64} {
  func.func @probe(%arg0: memref<16x256xf32, #tpu.memory_space<vmem>>, %arg1: memref<16x256xf32, #tpu.memory_space<vmem>>) attributes {dimension_semantics = [], scalar_prefetch = 0 : i64, scratch_operands = 0 : i64, tpu.core_type = #tpu.core_type<tc>} {
    %c0 = arith.constant 0 : index
    %c0_0 = arith.constant 0 : index
    %0 = vector.load %arg0[%c0, %c0_0] : memref<16x256xf32, #tpu.memory_space<vmem>>, vector<16x256xf32>
    %c17_i32 = arith.constant 17 : i32
    %1 = tpu.dynamic_rotate %0 by %c17_i32 dim 1 : vector<16x256xf32>, i32 -> vector<16x256xf32>
    %c0_1 = arith.constant 0 : index
    %c0_2 = arith.constant 0 : index
    %2 = vector.load %arg1[%c0_1, %c0_2] : memref<16x256xf32, #tpu.memory_space<vmem>>, vector<16x256xf32>
    tpu.vector_store %arg1[%c0_1, %c0_2], %1 {strides = array<i32>} : memref<16x256xf32, #tpu.memory_space<vmem>>, vector<16x256xf32>,
    return
  }
}

module attributes {stable_mosaic.version = 11 : i64} {
  func.func @_nehd_kernel(%arg0: i32, %arg1: memref<1x4x256xf32, #tpu.memory_space<vmem>>, %arg2: memref<9x16x1xf32, #tpu.memory_space<vmem>>, %arg3: memref<9x16x1xf32, #tpu.memory_space<vmem>>, %arg4: memref<20x1xf32, #tpu.memory_space<vmem>>, %arg5: memref<20x1xf32, #tpu.memory_space<vmem>>, %arg6: memref<1x256xf32, #tpu.memory_space<vmem>>, %arg7: memref<1x1x20xf32, #tpu.memory_space<vmem>>) attributes {dimension_semantics = [#tpu.dimension_semantics<parallel>], iteration_bounds = array<i64: 2>, scalar_prefetch = 0 : i64, scratch_operands = 0 : i64, tpu.core_type = #tpu.core_type<tc>, window_params = [{transform_indices = @transform_0, window_bounds = array<i64: 1, 4, 256>}, {pipeline_mode = #tpu.pipeline_mode<synchronous>, transform_indices = @transform_1, window_bounds = array<i64: 9, 16, 1>}, {pipeline_mode = #tpu.pipeline_mode<synchronous>, transform_indices = @transform_2, window_bounds = array<i64: 9, 16, 1>}, {pipeline_mode = #tpu.pipeline_mode<synchronous>, transform_indices = @transform_3, window_bounds = array<i64: 20, 1>}, {pipeline_mode = #tpu.pipeline_mode<synchronous>, transform_indices = @transform_4, window_bounds = array<i64: 20, 1>}, {pipeline_mode = #tpu.pipeline_mode<synchronous>, transform_indices = @transform_5, window_bounds = array<i64: 1, 256>}, {transform_indices = @transform_6, window_bounds = array<i64: 1, 1, 20>}]} {
    %c0 = arith.constant 0 : index
    %c0_0 = arith.constant 0 : index
    %c0_1 = arith.constant 0 : index
    %0 = vector.load %arg1[%c0, %c0_0, %c0_1] : memref<1x4x256xf32, #tpu.memory_space<vmem>>, vector<1x4x256xf32>
    %1 = vector.shape_cast %0 : vector<1x4x256xf32> to vector<4x256xf32>
    %c0_2 = arith.constant 0 : index
    %c0_3 = arith.constant 0 : index
    %2 = vector.load %arg6[%c0_2, %c0_3] : memref<1x256xf32, #tpu.memory_space<vmem>>, vector<1x256xf32>
    %3 = vector.extract_strided_slice %1 {offsets = [0, 0], sizes = [1, 256], strides = [1, 1]} : vector<4x256xf32> to vector<1x256xf32>
    %4 = vector.shape_cast %3 : vector<1x256xf32> to vector<1x256xf32>
    %5 = vector.broadcast %4 : vector<1x256xf32> to vector<4x256xf32>
    %6 = vector.extract_strided_slice %1 {offsets = [1, 0], sizes = [1, 256], strides = [1, 1]} : vector<4x256xf32> to vector<1x256xf32>
    %7 = vector.shape_cast %6 : vector<1x256xf32> to vector<1x256xf32>
    %8 = vector.broadcast %7 : vector<1x256xf32> to vector<4x256xf32>
    %9 = vector.extract_strided_slice %1 {offsets = [2, 0], sizes = [1, 256], strides = [1, 1]} : vector<4x256xf32> to vector<1x256xf32>
    %10 = vector.shape_cast %9 : vector<1x256xf32> to vector<1x256xf32>
    %11 = vector.broadcast %10 : vector<1x256xf32> to vector<4x256xf32>
    %12 = vector.extract_strided_slice %1 {offsets = [3, 0], sizes = [1, 256], strides = [1, 1]} : vector<4x256xf32> to vector<1x256xf32>
    %13 = vector.shape_cast %12 : vector<1x256xf32> to vector<1x256xf32>
    %14 = vector.broadcast %13 : vector<1x256xf32> to vector<4x256xf32>
    %15 = tpu.concatenate %5, %8, %11, %14 in 0 : vector<4x256xf32>, vector<4x256xf32>, vector<4x256xf32>, vector<4x256xf32> -> vector<16x256xf32>
    %cst = arith.constant 0.000000e+00 : f32
    %16 = vector.broadcast %cst : f32 to vector<16x256xf32>
    %c0_4 = arith.constant 0 : index
    %c0_5 = arith.constant 0 : index
    %c0_6 = arith.constant 0 : index
    %17 = vector.load %arg2[%c0_4, %c0_5, %c0_6] : memref<9x16x1xf32, #tpu.memory_space<vmem>>, vector<1x16x1xf32>
    %18 = vector.shape_cast %17 : vector<1x16x1xf32> to vector<16x1xf32>
    %19 = vector.broadcast %18 : vector<16x1xf32> to vector<16x256xf32>
    %20 = arith.mulf %19, %15 : vector<16x256xf32>
    %21 = arith.addf %16, %20 : vector<16x256xf32>
    %c1 = arith.constant 1 : index
    %c0_7 = arith.constant 0 : index
    %c0_8 = arith.constant 0 : index
    %22 = vector.load %arg2[%c1, %c0_7, %c0_8] : memref<9x16x1xf32, #tpu.memory_space<vmem>>, vector<1x16x1xf32>
    %23 = vector.shape_cast %22 : vector<1x16x1xf32> to vector<16x1xf32>
    %24 = vector.extract_strided_slice %15 {offsets = [0, 1], sizes = [16, 255], strides = [1, 1]} : vector<16x256xf32> to vector<16x255xf32>
    %cst_9 = arith.constant 0.000000e+00 : f32
    %25 = vector.broadcast %cst_9 : f32 to vector<16x1xf32>
    %26 = tpu.concatenate %24, %25 in 1 : vector<16x255xf32>, vector<16x1xf32> -> vector<16x256xf32>
    %27 = vector.broadcast %23 : vector<16x1xf32> to vector<16x256xf32>
    %28 = arith.mulf %27, %26 : vector<16x256xf32>
    %29 = arith.addf %21, %28 : vector<16x256xf32>
    %c2 = arith.constant 2 : index
    %c0_10 = arith.constant 0 : index
    %c0_11 = arith.constant 0 : index
    %30 = vector.load %arg2[%c2, %c0_10, %c0_11] : memref<9x16x1xf32, #tpu.memory_space<vmem>>, vector<1x16x1xf32>
    %31 = vector.shape_cast %30 : vector<1x16x1xf32> to vector<16x1xf32>
    %32 = vector.extract_strided_slice %15 {offsets = [0, 2], sizes = [16, 254], strides = [1, 1]} : vector<16x256xf32> to vector<16x254xf32>
    %cst_12 = arith.constant 0.000000e+00 : f32
    %33 = vector.broadcast %cst_12 : f32 to vector<16x2xf32>
    %34 = tpu.concatenate %32, %33 in 1 : vector<16x254xf32>, vector<16x2xf32> -> vector<16x256xf32>
    %35 = vector.broadcast %31 : vector<16x1xf32> to vector<16x256xf32>
    %36 = arith.mulf %35, %34 : vector<16x256xf32>
    %37 = arith.addf %29, %36 : vector<16x256xf32>
    %c3 = arith.constant 3 : index
    %c0_13 = arith.constant 0 : index
    %c0_14 = arith.constant 0 : index
    %38 = vector.load %arg2[%c3, %c0_13, %c0_14] : memref<9x16x1xf32, #tpu.memory_space<vmem>>, vector<1x16x1xf32>
    %39 = vector.shape_cast %38 : vector<1x16x1xf32> to vector<16x1xf32>
    %40 = vector.extract_strided_slice %15 {offsets = [0, 16], sizes = [16, 240], strides = [1, 1]} : vector<16x256xf32> to vector<16x240xf32>
    %cst_15 = arith.constant 0.000000e+00 : f32
    %41 = vector.broadcast %cst_15 : f32 to vector<16x16xf32>
    %42 = tpu.concatenate %40, %41 in 1 : vector<16x240xf32>, vector<16x16xf32> -> vector<16x256xf32>
    %43 = vector.broadcast %39 : vector<16x1xf32> to vector<16x256xf32>
    %44 = arith.mulf %43, %42 : vector<16x256xf32>
    %45 = arith.addf %37, %44 : vector<16x256xf32>
    %c4 = arith.constant 4 : index
    %c0_16 = arith.constant 0 : index
    %c0_17 = arith.constant 0 : index
    %46 = vector.load %arg2[%c4, %c0_16, %c0_17] : memref<9x16x1xf32, #tpu.memory_space<vmem>>, vector<1x16x1xf32>
    %47 = vector.shape_cast %46 : vector<1x16x1xf32> to vector<16x1xf32>
    %48 = vector.extract_strided_slice %15 {offsets = [0, 17], sizes = [16, 239], strides = [1, 1]} : vector<16x256xf32> to vector<16x239xf32>
    %cst_18 = arith.constant 0.000000e+00 : f32
    %49 = vector.broadcast %cst_18 : f32 to vector<16x17xf32>
    %50 = tpu.concatenate %48, %49 in 1 : vector<16x239xf32>, vector<16x17xf32> -> vector<16x256xf32>
    %51 = vector.broadcast %47 : vector<16x1xf32> to vector<16x256xf32>
    %52 = arith.mulf %51, %50 : vector<16x256xf32>
    %53 = arith.addf %45, %52 : vector<16x256xf32>
    %c5 = arith.constant 5 : index
    %c0_19 = arith.constant 0 : index
    %c0_20 = arith.constant 0 : index
    %54 = vector.load %arg2[%c5, %c0_19, %c0_20] : memref<9x16x1xf32, #tpu.memory_space<vmem>>, vector<1x16x1xf32>
    %55 = vector.shape_cast %54 : vector<1x16x1xf32> to vector<16x1xf32>
    %56 = vector.extract_strided_slice %15 {offsets = [0, 18], sizes = [16, 238], strides = [1, 1]} : vector<16x256xf32> to vector<16x238xf32>
    %cst_21 = arith.constant 0.000000e+00 : f32
    %57 = vector.broadcast %cst_21 : f32 to vector<16x18xf32>
    %58 = tpu.concatenate %56, %57 in 1 : vector<16x238xf32>, vector<16x18xf32> -> vector<16x256xf32>
    %59 = vector.broadcast %55 : vector<16x1xf32> to vector<16x256xf32>
    %60 = arith.mulf %59, %58 : vector<16x256xf32>
    %61 = arith.addf %53, %60 : vector<16x256xf32>
    %c6 = arith.constant 6 : index
    %c0_22 = arith.constant 0 : index
    %c0_23 = arith.constant 0 : index
    %62 = vector.load %arg2[%c6, %c0_22, %c0_23] : memref<9x16x1xf32, #tpu.memory_space<vmem>>, vector<1x16x1xf32>
    %63 = vector.shape_cast %62 : vector<1x16x1xf32> to vector<16x1xf32>
    %64 = vector.extract_strided_slice %15 {offsets = [0, 32], sizes = [16, 224], strides = [1, 1]} : vector<16x256xf32> to vector<16x224xf32>
    %cst_24 = arith.constant 0.000000e+00 : f32
    %65 = vector.broadcast %cst_24 : f32 to vector<16x32xf32>
    %66 = tpu.concatenate %64, %65 in 1 : vector<16x224xf32>, vector<16x32xf32> -> vector<16x256xf32>
    %67 = vector.broadcast %63 : vector<16x1xf32> to vector<16x256xf32>
    %68 = arith.mulf %67, %66 : vector<16x256xf32>
    %69 = arith.addf %61, %68 : vector<16x256xf32>
    %c7 = arith.constant 7 : index
    %c0_25 = arith.constant 0 : index
    %c0_26 = arith.constant 0 : index
    %70 = vector.load %arg2[%c7, %c0_25, %c0_26] : memref<9x16x1xf32, #tpu.memory_space<vmem>>, vector<1x16x1xf32>
    %71 = vector.shape_cast %70 : vector<1x16x1xf32> to vector<16x1xf32>
    %72 = vector.extract_strided_slice %15 {offsets = [0, 33], sizes = [16, 223], strides = [1, 1]} : vector<16x256xf32> to vector<16x223xf32>
    %cst_27 = arith.constant 0.000000e+00 : f32
    %73 = vector.broadcast %cst_27 : f32 to vector<16x33xf32>
    %74 = tpu.concatenate %72, %73 in 1 : vector<16x223xf32>, vector<16x33xf32> -> vector<16x256xf32>
    %75 = vector.broadcast %71 : vector<16x1xf32> to vector<16x256xf32>
    %76 = arith.mulf %75, %74 : vector<16x256xf32>
    %77 = arith.addf %69, %76 : vector<16x256xf32>
    %c8 = arith.constant 8 : index
    %c0_28 = arith.constant 0 : index
    %c0_29 = arith.constant 0 : index
    %78 = vector.load %arg2[%c8, %c0_28, %c0_29] : memref<9x16x1xf32, #tpu.memory_space<vmem>>, vector<1x16x1xf32>
    %79 = vector.shape_cast %78 : vector<1x16x1xf32> to vector<16x1xf32>
    %80 = vector.extract_strided_slice %15 {offsets = [0, 34], sizes = [16, 222], strides = [1, 1]} : vector<16x256xf32> to vector<16x222xf32>
    %cst_30 = arith.constant 0.000000e+00 : f32
    %81 = vector.broadcast %cst_30 : f32 to vector<16x34xf32>
    %82 = tpu.concatenate %80, %81 in 1 : vector<16x222xf32>, vector<16x34xf32> -> vector<16x256xf32>
    %83 = vector.broadcast %79 : vector<16x1xf32> to vector<16x256xf32>
    %84 = arith.mulf %83, %82 : vector<16x256xf32>
    %85 = arith.addf %77, %84 : vector<16x256xf32>
    %86 = vector.broadcast %2 : vector<1x256xf32> to vector<16x256xf32>
    %87 = arith.mulf %85, %86 : vector<16x256xf32>
    %cst_31 = arith.constant 0.000000e+00 : f32
    %88 = vector.broadcast %cst_31 : f32 to vector<16x17xf32>
    %89 = vector.extract_strided_slice %87 {offsets = [0, 0], sizes = [16, 239], strides = [1, 1]} : vector<16x256xf32> to vector<16x239xf32>
    %90 = tpu.concatenate %88, %89 in 1 : vector<16x17xf32>, vector<16x239xf32> -> vector<16x256xf32>
    %cst_32 = arith.constant 0.000000e+00 : f32
    %91 = vector.broadcast %cst_32 : f32 to vector<16x256xf32>
    %c0_33 = arith.constant 0 : index
    %c0_34 = arith.constant 0 : index
    %c0_35 = arith.constant 0 : index
    %92 = vector.load %arg3[%c0_33, %c0_34, %c0_35] : memref<9x16x1xf32, #tpu.memory_space<vmem>>, vector<1x16x1xf32>
    %93 = vector.shape_cast %92 : vector<1x16x1xf32> to vector<16x1xf32>
    %94 = vector.broadcast %93 : vector<16x1xf32> to vector<16x256xf32>
    %95 = arith.mulf %94, %90 : vector<16x256xf32>
    %96 = arith.addf %91, %95 : vector<16x256xf32>
    %c1_36 = arith.constant 1 : index
    %c0_37 = arith.constant 0 : index
    %c0_38 = arith.constant 0 : index
    %97 = vector.load %arg3[%c1_36, %c0_37, %c0_38] : memref<9x16x1xf32, #tpu.memory_space<vmem>>, vector<1x16x1xf32>
    %98 = vector.shape_cast %97 : vector<1x16x1xf32> to vector<16x1xf32>
    %99 = vector.extract_strided_slice %90 {offsets = [0, 1], sizes = [16, 255], strides = [1, 1]} : vector<16x256xf32> to vector<16x255xf32>
    %cst_39 = arith.constant 0.000000e+00 : f32
    %100 = vector.broadcast %cst_39 : f32 to vector<16x1xf32>
    %101 = tpu.concatenate %99, %100 in 1 : vector<16x255xf32>, vector<16x1xf32> -> vector<16x256xf32>
    %102 = vector.broadcast %98 : vector<16x1xf32> to vector<16x256xf32>
    %103 = arith.mulf %102, %101 : vector<16x256xf32>
    %104 = arith.addf %96, %103 : vector<16x256xf32>
    %c2_40 = arith.constant 2 : index
    %c0_41 = arith.constant 0 : index
    %c0_42 = arith.constant 0 : index
    %105 = vector.load %arg3[%c2_40, %c0_41, %c0_42] : memref<9x16x1xf32, #tpu.memory_space<vmem>>, vector<1x16x1xf32>
    %106 = vector.shape_cast %105 : vector<1x16x1xf32> to vector<16x1xf32>
    %107 = vector.extract_strided_slice %90 {offsets = [0, 2], sizes = [16, 254], strides = [1, 1]} : vector<16x256xf32> to vector<16x254xf32>
    %cst_43 = arith.constant 0.000000e+00 : f32
    %108 = vector.broadcast %cst_43 : f32 to vector<16x2xf32>
    %109 = tpu.concatenate %107, %108 in 1 : vector<16x254xf32>, vector<16x2xf32> -> vector<16x256xf32>
    %110 = vector.broadcast %106 : vector<16x1xf32> to vector<16x256xf32>
    %111 = arith.mulf %110, %109 : vector<16x256xf32>
    %112 = arith.addf %104, %111 : vector<16x256xf32>
    %c3_44 = arith.constant 3 : index
    %c0_45 = arith.constant 0 : index
    %c0_46 = arith.constant 0 : index
    %113 = vector.load %arg3[%c3_44, %c0_45, %c0_46] : memref<9x16x1xf32, #tpu.memory_space<vmem>>, vector<1x16x1xf32>
    %114 = vector.shape_cast %113 : vector<1x16x1xf32> to vector<16x1xf32>
    %115 = vector.extract_strided_slice %90 {offsets = [0, 16], sizes = [16, 240], strides = [1, 1]} : vector<16x256xf32> to vector<16x240xf32>
    %cst_47 = arith.constant 0.000000e+00 : f32
    %116 = vector.broadcast %cst_47 : f32 to vector<16x16xf32>
    %117 = tpu.concatenate %115, %116 in 1 : vector<16x240xf32>, vector<16x16xf32> -> vector<16x256xf32>
    %118 = vector.broadcast %114 : vector<16x1xf32> to vector<16x256xf32>
    %119 = arith.mulf %118, %117 : vector<16x256xf32>
    %120 = arith.addf %112, %119 : vector<16x256xf32>
    %c4_48 = arith.constant 4 : index
    %c0_49 = arith.constant 0 : index
    %c0_50 = arith.constant 0 : index
    %121 = vector.load %arg3[%c4_48, %c0_49, %c0_50] : memref<9x16x1xf32, #tpu.memory_space<vmem>>, vector<1x16x1xf32>
    %122 = vector.shape_cast %121 : vector<1x16x1xf32> to vector<16x1xf32>
    %123 = vector.extract_strided_slice %90 {offsets = [0, 17], sizes = [16, 239], strides = [1, 1]} : vector<16x256xf32> to vector<16x239xf32>
    %cst_51 = arith.constant 0.000000e+00 : f32
    %124 = vector.broadcast %cst_51 : f32 to vector<16x17xf32>
    %125 = tpu.concatenate %123, %124 in 1 : vector<16x239xf32>, vector<16x17xf32> -> vector<16x256xf32>
    %126 = vector.broadcast %122 : vector<16x1xf32> to vector<16x256xf32>
    %127 = arith.mulf %126, %125 : vector<16x256xf32>
    %128 = arith.addf %120, %127 : vector<16x256xf32>
    %c5_52 = arith.constant 5 : index
    %c0_53 = arith.constant 0 : index
    %c0_54 = arith.constant 0 : index
    %129 = vector.load %arg3[%c5_52, %c0_53, %c0_54] : memref<9x16x1xf32, #tpu.memory_space<vmem>>, vector<1x16x1xf32>
    %130 = vector.shape_cast %129 : vector<1x16x1xf32> to vector<16x1xf32>
    %131 = vector.extract_strided_slice %90 {offsets = [0, 18], sizes = [16, 238], strides = [1, 1]} : vector<16x256xf32> to vector<16x238xf32>
    %cst_55 = arith.constant 0.000000e+00 : f32
    %132 = vector.broadcast %cst_55 : f32 to vector<16x18xf32>
    %133 = tpu.concatenate %131, %132 in 1 : vector<16x238xf32>, vector<16x18xf32> -> vector<16x256xf32>
    %134 = vector.broadcast %130 : vector<16x1xf32> to vector<16x256xf32>
    %135 = arith.mulf %134, %133 : vector<16x256xf32>
    %136 = arith.addf %128, %135 : vector<16x256xf32>
    %c6_56 = arith.constant 6 : index
    %c0_57 = arith.constant 0 : index
    %c0_58 = arith.constant 0 : index
    %137 = vector.load %arg3[%c6_56, %c0_57, %c0_58] : memref<9x16x1xf32, #tpu.memory_space<vmem>>, vector<1x16x1xf32>
    %138 = vector.shape_cast %137 : vector<1x16x1xf32> to vector<16x1xf32>
    %139 = vector.extract_strided_slice %90 {offsets = [0, 32], sizes = [16, 224], strides = [1, 1]} : vector<16x256xf32> to vector<16x224xf32>
    %cst_59 = arith.constant 0.000000e+00 : f32
    %140 = vector.broadcast %cst_59 : f32 to vector<16x32xf32>
    %141 = tpu.concatenate %139, %140 in 1 : vector<16x224xf32>, vector<16x32xf32> -> vector<16x256xf32>
    %142 = vector.broadcast %138 : vector<16x1xf32> to vector<16x256xf32>
    %143 = arith.mulf %142, %141 : vector<16x256xf32>
    %144 = arith.addf %136, %143 : vector<16x256xf32>
    %c7_60 = arith.constant 7 : index
    %c0_61 = arith.constant 0 : index
    %c0_62 = arith.constant 0 : index
    %145 = vector.load %arg3[%c7_60, %c0_61, %c0_62] : memref<9x16x1xf32, #tpu.memory_space<vmem>>, vector<1x16x1xf32>
    %146 = vector.shape_cast %145 : vector<1x16x1xf32> to vector<16x1xf32>
    %147 = vector.extract_strided_slice %90 {offsets = [0, 33], sizes = [16, 223], strides = [1, 1]} : vector<16x256xf32> to vector<16x223xf32>
    %cst_63 = arith.constant 0.000000e+00 : f32
    %148 = vector.broadcast %cst_63 : f32 to vector<16x33xf32>
    %149 = tpu.concatenate %147, %148 in 1 : vector<16x223xf32>, vector<16x33xf32> -> vector<16x256xf32>
    %150 = vector.broadcast %146 : vector<16x1xf32> to vector<16x256xf32>
    %151 = arith.mulf %150, %149 : vector<16x256xf32>
    %152 = arith.addf %144, %151 : vector<16x256xf32>
    %c8_64 = arith.constant 8 : index
    %c0_65 = arith.constant 0 : index
    %c0_66 = arith.constant 0 : index
    %153 = vector.load %arg3[%c8_64, %c0_65, %c0_66] : memref<9x16x1xf32, #tpu.memory_space<vmem>>, vector<1x16x1xf32>
    %154 = vector.shape_cast %153 : vector<1x16x1xf32> to vector<16x1xf32>
    %155 = vector.extract_strided_slice %90 {offsets = [0, 34], sizes = [16, 222], strides = [1, 1]} : vector<16x256xf32> to vector<16x222xf32>
    %cst_67 = arith.constant 0.000000e+00 : f32
    %156 = vector.broadcast %cst_67 : f32 to vector<16x34xf32>
    %157 = tpu.concatenate %155, %156 in 1 : vector<16x222xf32>, vector<16x34xf32> -> vector<16x256xf32>
    %158 = vector.broadcast %154 : vector<16x1xf32> to vector<16x256xf32>
    %159 = arith.mulf %158, %157 : vector<16x256xf32>
    %160 = arith.addf %152, %159 : vector<16x256xf32>
    %161 = vector.extract_strided_slice %160 {offsets = [0, 0], sizes = [4, 256], strides = [1, 1]} : vector<16x256xf32> to vector<4x256xf32>
    %cst_68 = arith.constant dense<0.000000e+00> : vector<256xf32>
    %162 = vector.multi_reduction <add>, %161, %cst_68 [0] : vector<4x256xf32> to vector<256xf32>
    %163 = vector.shape_cast %162 : vector<256xf32> to vector<1x256xf32>
    %164 = vector.extract_strided_slice %160 {offsets = [4, 0], sizes = [4, 256], strides = [1, 1]} : vector<16x256xf32> to vector<4x256xf32>
    %cst_69 = arith.constant dense<0.000000e+00> : vector<256xf32>
    %165 = vector.multi_reduction <add>, %164, %cst_69 [0] : vector<4x256xf32> to vector<256xf32>
    %166 = vector.shape_cast %165 : vector<256xf32> to vector<1x256xf32>
    %167 = vector.extract_strided_slice %160 {offsets = [8, 0], sizes = [4, 256], strides = [1, 1]} : vector<16x256xf32> to vector<4x256xf32>
    %cst_70 = arith.constant dense<0.000000e+00> : vector<256xf32>
    %168 = vector.multi_reduction <add>, %167, %cst_70 [0] : vector<4x256xf32> to vector<256xf32>
    %169 = vector.shape_cast %168 : vector<256xf32> to vector<1x256xf32>
    %170 = vector.extract_strided_slice %160 {offsets = [12, 0], sizes = [4, 256], strides = [1, 1]} : vector<16x256xf32> to vector<4x256xf32>
    %cst_71 = arith.constant dense<0.000000e+00> : vector<256xf32>
    %171 = vector.multi_reduction <add>, %170, %cst_71 [0] : vector<4x256xf32> to vector<256xf32>
    %172 = vector.shape_cast %171 : vector<256xf32> to vector<1x256xf32>
    %173 = tpu.concatenate %163, %166, %169, %172 in 0 : vector<1x256xf32>, vector<1x256xf32>, vector<1x256xf32>, vector<1x256xf32> -> vector<4x256xf32>
    %174 = arith.negf %173 : vector<4x256xf32>
    %175 = math.exp %174 : vector<4x256xf32>
    %cst_72 = arith.constant 1.000000e+00 : f32
    %176 = vector.broadcast %cst_72 : f32 to vector<4x256xf32>
    %177 = arith.addf %176, %175 : vector<4x256xf32>
    %178 = arith.divf %176, %177 : vector<4x256xf32>
    %179 = tpu.concatenate %87, %178 in 0 : vector<16x256xf32>, vector<4x256xf32> -> vector<20x256xf32>
    %c0_73 = arith.constant 0 : index
    %c0_74 = arith.constant 0 : index
    %180 = vector.load %arg5[%c0_73, %c0_74] : memref<20x1xf32, #tpu.memory_space<vmem>>, vector<20x1xf32>
    %c0_75 = arith.constant 0 : index
    %c0_76 = arith.constant 0 : index
    %181 = vector.load %arg4[%c0_75, %c0_76] : memref<20x1xf32, #tpu.memory_space<vmem>>, vector<20x1xf32>
    %182 = vector.broadcast %181 : vector<20x1xf32> to vector<20x256xf32>
    %183 = arith.addf %179, %182 : vector<20x256xf32>
    %184 = vector.broadcast %180 : vector<20x1xf32> to vector<20x256xf32>
    %185 = arith.mulf %184, %183 : vector<20x256xf32>
    %186 = arith.mulf %185, %185 : vector<20x256xf32>
    %cst_77 = arith.constant 0.000000e+00 : f32
    %187 = vector.broadcast %cst_77 : f32 to vector<20x256xf32>
    %188 = arith.subf %187, %186 : vector<20x256xf32>
    %189 = math.exp %188 : vector<20x256xf32>
    %cst_78 = arith.constant 0.00510204071 : f32
    %190 = vector.broadcast %cst_78 : f32 to vector<1x256xf32>
    %191 = arith.mulf %2, %190 : vector<1x256xf32>
    %192 = vector.extract_strided_slice %189 {offsets = [0, 0], sizes = [5, 256], strides = [1, 1]} : vector<20x256xf32> to vector<5x256xf32>
    %cst_79 = arith.constant dense<0.000000e+00> : vector<256xf32>
    %193 = vector.multi_reduction <add>, %192, %cst_79 [0] : vector<5x256xf32> to vector<256xf32>
    %194 = vector.shape_cast %193 : vector<256xf32> to vector<1x256xf32>
    %cst_80 = arith.constant 9.99999974E-6 : f32
    %195 = vector.broadcast %cst_80 : f32 to vector<1x256xf32>
    %196 = arith.addf %194, %195 : vector<1x256xf32>
    %197 = tpu.reciprocal %196 {approx = true} : vector<1x256xf32> -> vector<1x256xf32>
    %198 = arith.mulf %197, %191 : vector<1x256xf32>
    %199 = vector.broadcast %198 : vector<1x256xf32> to vector<5x256xf32>
    %200 = arith.mulf %192, %199 : vector<5x256xf32>
    %cst_81 = arith.constant dense<0.000000e+00> : vector<5xf32>
    %201 = vector.multi_reduction <add>, %200, %cst_81 [1] : vector<5x256xf32> to vector<5xf32>
    %202 = vector.extract_strided_slice %189 {offsets = [5, 0], sizes = [5, 256], strides = [1, 1]} : vector<20x256xf32> to vector<5x256xf32>
    %cst_82 = arith.constant dense<0.000000e+00> : vector<256xf32>
    %203 = vector.multi_reduction <add>, %202, %cst_82 [0] : vector<5x256xf32> to vector<256xf32>
    %204 = vector.shape_cast %203 : vector<256xf32> to vector<1x256xf32>
    %cst_83 = arith.constant 9.99999974E-6 : f32
    %205 = vector.broadcast %cst_83 : f32 to vector<1x256xf32>
    %206 = arith.addf %204, %205 : vector<1x256xf32>
    %207 = tpu.reciprocal %206 {approx = true} : vector<1x256xf32> -> vector<1x256xf32>
    %208 = arith.mulf %207, %191 : vector<1x256xf32>
    %209 = vector.broadcast %208 : vector<1x256xf32> to vector<5x256xf32>
    %210 = arith.mulf %202, %209 : vector<5x256xf32>
    %cst_84 = arith.constant dense<0.000000e+00> : vector<5xf32>
    %211 = vector.multi_reduction <add>, %210, %cst_84 [1] : vector<5x256xf32> to vector<5xf32>
    %212 = vector.extract_strided_slice %189 {offsets = [10, 0], sizes = [5, 256], strides = [1, 1]} : vector<20x256xf32> to vector<5x256xf32>
    %cst_85 = arith.constant dense<0.000000e+00> : vector<256xf32>
    %213 = vector.multi_reduction <add>, %212, %cst_85 [0] : vector<5x256xf32> to vector<256xf32>
    %214 = vector.shape_cast %213 : vector<256xf32> to vector<1x256xf32>
    %cst_86 = arith.constant 9.99999974E-6 : f32
    %215 = vector.broadcast %cst_86 : f32 to vector<1x256xf32>
    %216 = arith.addf %214, %215 : vector<1x256xf32>
    %217 = tpu.reciprocal %216 {approx = true} : vector<1x256xf32> -> vector<1x256xf32>
    %218 = arith.mulf %217, %191 : vector<1x256xf32>
    %219 = vector.broadcast %218 : vector<1x256xf32> to vector<5x256xf32>
    %220 = arith.mulf %212, %219 : vector<5x256xf32>
    %cst_87 = arith.constant dense<0.000000e+00> : vector<5xf32>
    %221 = vector.multi_reduction <add>, %220, %cst_87 [1] : vector<5x256xf32> to vector<5xf32>
    %222 = vector.extract_strided_slice %189 {offsets = [15, 0], sizes = [5, 256], strides = [1, 1]} : vector<20x256xf32> to vector<5x256xf32>
    %cst_88 = arith.constant dense<0.000000e+00> : vector<256xf32>
    %223 = vector.multi_reduction <add>, %222, %cst_88 [0] : vector<5x256xf32> to vector<256xf32>
    %224 = vector.shape_cast %223 : vector<256xf32> to vector<1x256xf32>
    %cst_89 = arith.constant 9.99999974E-6 : f32
    %225 = vector.broadcast %cst_89 : f32 to vector<1x256xf32>
    %226 = arith.addf %224, %225 : vector<1x256xf32>
    %227 = tpu.reciprocal %226 {approx = true} : vector<1x256xf32> -> vector<1x256xf32>
    %228 = arith.mulf %227, %191 : vector<1x256xf32>
    %229 = vector.broadcast %228 : vector<1x256xf32> to vector<5x256xf32>
    %230 = arith.mulf %222, %229 : vector<5x256xf32>
    %cst_90 = arith.constant dense<0.000000e+00> : vector<5xf32>
    %231 = vector.multi_reduction <add>, %230, %cst_90 [1] : vector<5x256xf32> to vector<5xf32>
    %232 = tpu.concatenate %201, %211, %221, %231 in 0 : vector<5xf32>, vector<5xf32>, vector<5xf32>, vector<5xf32> -> vector<20xf32>
    %c0_91 = arith.constant 0 : index
    %c0_92 = arith.constant 0 : index
    %c0_93 = arith.constant 0 : index
    %233 = vector.load %arg7[%c0_91, %c0_92, %c0_93] : memref<1x1x20xf32, #tpu.memory_space<vmem>>, vector<1x1x20xf32>
    %234 = vector.shape_cast %233 : vector<1x1x20xf32> to vector<20xf32>
    %235 = vector.shape_cast %232 : vector<20xf32> to vector<1x1x20xf32>
    tpu.vector_store %arg7[%c0_91, %c0_92, %c0_93], %235 {strides = array<i32>} : memref<1x1x20xf32, #tpu.memory_space<vmem>>, vector<1x1x20xf32>,
    return
  }
  func.func @transform_0(%arg0: i32) -> (i32, i32, i32) {
    %c0_i32 = arith.constant 0 : i32
    %c0_i32_0 = arith.constant 0 : i32
    %c0_i32_1 = arith.constant 0 : i32
    return %arg0, %c0_i32, %c0_i32_0 : i32, i32, i32
  }
  func.func @transform_1(%arg0: i32) -> (i32, i32, i32) {
    %c0_i32 = arith.constant 0 : i32
    %c0_i32_0 = arith.constant 0 : i32
    %c0_i32_1 = arith.constant 0 : i32
    %c0_i32_2 = arith.constant 0 : i32
    return %c0_i32, %c0_i32_0, %c0_i32_1 : i32, i32, i32
  }
  func.func @transform_2(%arg0: i32) -> (i32, i32, i32) {
    %c0_i32 = arith.constant 0 : i32
    %c0_i32_0 = arith.constant 0 : i32
    %c0_i32_1 = arith.constant 0 : i32
    %c0_i32_2 = arith.constant 0 : i32
    return %c0_i32, %c0_i32_0, %c0_i32_1 : i32, i32, i32
  }
  func.func @transform_3(%arg0: i32) -> (i32, i32) {
    %c0_i32 = arith.constant 0 : i32
    %c0_i32_0 = arith.constant 0 : i32
    %c0_i32_1 = arith.constant 0 : i32
    return %c0_i32, %c0_i32_0 : i32, i32
  }
  func.func @transform_4(%arg0: i32) -> (i32, i32) {
    %c0_i32 = arith.constant 0 : i32
    %c0_i32_0 = arith.constant 0 : i32
    %c0_i32_1 = arith.constant 0 : i32
    return %c0_i32, %c0_i32_0 : i32, i32
  }
  func.func @transform_5(%arg0: i32) -> (i32, i32) {
    %c0_i32 = arith.constant 0 : i32
    %c0_i32_0 = arith.constant 0 : i32
    %c0_i32_1 = arith.constant 0 : i32
    return %c0_i32, %c0_i32_0 : i32, i32
  }
  func.func @transform_6(%arg0: i32) -> (i32, i32, i32) {
    %c0_i32 = arith.constant 0 : i32
    %c0_i32_0 = arith.constant 0 : i32
    %c0_i32_1 = arith.constant 0 : i32
    return %arg0, %c0_i32, %c0_i32_0 : i32, i32, i32
  }
}

</mosaic_0001>

<bundles_post_ra>
// kernel: tpu_custom_call.1
= control target key start
LH: loop header
LB: loop body
LE: loop exit
PB: predicated region body
PF: predicated region fallthrough
CT: control target
= control target key end

     0   :  { %6 = vsyncpa [#allocation3], 0  ;;  %s151_s0 = inlined_call_operand.hbm [shape: f32[16,256], index: 0, kind: input, shape index: {}]   ;;  %s152_s1 = inlined_call_operand.hbm [shape: f32[16,256], index: 1, kind: output, shape index: {}]  }
   0x1   :  { %7 = vsyncpa [#allocation4], 0  ;;  %s12_s8 = sshll.u32 %s151_s0, 4  ;;  %s124_s9 = smov [#allocation2]   ;;  %s13_s8 = int_to_ptr.hbm [resolvable:$true] %s12_s8 }
   0x2   :  { %s14_s10 = sshll.u32 %s124_s9, 4  ;;  %s125_s11 = smov 256   ;;  %s15_s10 = int_to_ptr.vmem [resolvable:$true] %s14_s10 }
   0x3   :  { %s126_s12 = smov 16  }
   0x4   :  { %20 = dma.hbm_to_vmem [thread:$0]  %s13_s8, 512, %s15_s10, [#allocation3], %s125_s11, %s125_s11, %s126_s12  }
   0x5   :  { %120 = dma.done.wait [#allocation3], 512  }
   0x6   :  { %121 = vsyncadd [#allocation3], 4294966784  ;;  %v26_v0 = vld [vmem:[#allocation2 + $0x8] sm:$0xff]  ;;  %v25_v1 = vld [vmem:[#allocation2] sm:$0xff]  ;;  %s127_s13 = smov 17   ;;  %v37_v4 = vlaneseq  ;;  %s128_s0 = smov [#allocation5]  }
   0x7   :  { %33 = vrot.lane.b32.xlu1 %v26_v0, %s127_s13  ;;  %29 = vrot.lane.b32.xlu0 %v25_v1, %s127_s13  ;;  %v28_v2 = vld [vmem:[#allocation2 + $0x18] sm:$0xff]  ;;  %v27_v3 = vld [vmem:[#allocation2 + $0x10] sm:$0xff]  ;;  %s52_s14 = sshll.u32 %s128_s0, 4  ;;  %s54_s17 = sshll.u32 %s152_s1, 4  ;;  %s53_s14 = int_to_ptr.vmem [resolvable:$true] %s52_s14  ;;  %s55_s17 = int_to_ptr.hbm [resolvable:$true] %s54_s17 }
   0x8   :  { %v38_v5 = vand.u32 127, %v37_v4 }
   0xa   :  { %vm39_vm0 = vcmp.lt.s32.totalorder %v38_v5, 17 }
   0xf   :  { %35 = vrot.lane.b32.xlu1 %v28_v2, %s127_s13  ;;  %31 = vrot.lane.b32.xlu0 %v27_v3, %s127_s13 }
  0x79   :  { %v34_v6 = vpop.permute.xlu1 %33  ;;  %v30_v7 = vpop.permute.xlu0 %29 }
  0x7a   :  { %v40_v8 = vsel %vm39_vm0, %v30_v7, %v34_v6  ;;  %v42_v9 = vsel %vm39_vm0, %v34_v6, %v30_v7 }
  0x7b   :  { %44 = vst [vmem:[#allocation5] sm:$0xff] %v42_v9 }
  0x7c   :  { %45 = vst [vmem:[#allocation5 + $0x8] sm:$0xff] %v40_v8 }
  0x81   :  { %v36_v10 = vpop.permute.xlu1 %35  ;;  %v32_v11 = vpop.permute.xlu0 %31 }
  0x82   :  { %v41_v12 = vsel %vm39_vm0, %v32_v11, %v36_v10  ;;  %v43_v13 = vsel %vm39_vm0, %v36_v10, %v32_v11 }
  0x83   :  { %46 = vst [vmem:[#allocation5 + $0x10] sm:$0xff] %v43_v13 }
  0x84   :  { %47 = vst [vmem:[#allocation5 + $0x18] sm:$0xff] %v41_v12 }
  0x85   :  { %60 = dma.vmem_to_hbm [thread:$0]  %s53_s14, 512, %s55_s17, [#allocation4], %s125_s11, %s125_s11, %s126_s12  }
  0x86   :  { %122 = dma.done.wait [#allocation4], 512  }
  0x87   :  { %123 = vsyncadd [#allocation4], 4294966784 }
  0x88   :  { %65 = vsyncpa [#allocation3], 1 }
  0x89   :  { %66 = vsyncpa [#allocation4], 1 }

// kernel: tpu_custom_call.1
= control target key start
LH: loop header
LB: loop body
LE: loop exit
PB: predicated region body
PF: predicated region fallthrough
CT: control target
= control target key end

     0   :  { %11 = vsyncpa [#allocation3], 0  ;;  %s2347_s0 = inlined_call_operand.vmem [shape: f32[2,4,256], index: 0, kind: input, shape index: {}]   ;;  %s2348_s1 = inlined_call_operand.vmem [shape: f32[9,16,1], index: 1, kind: input, shape index: {}]   ;;  %s2349_s2 = inlined_call_operand.vmem [shape: f32[9,16,1], index: 2, kind: input, shape index: {}]   ;;  %s2350_s3 = inlined_call_operand.vmem [shape: f32[20,1], index: 3, kind: input, shape index: {}]   ;;  %s2351_s4 = inlined_call_operand.vmem [shape: f32[20,1], index: 4, kind: input, shape index: {}]   ;;  %s2352_s5 = inlined_call_operand.vmem [shape: f32[1,256], index: 5, kind: input, shape index: {}]   ;;  %s2353_s6 = inlined_call_operand.hbm [shape: f32[2,1,20], index: 6, kind: output, shape index: {}]  }
   0x1   :  { %13 = vsyncpa [#allocation3 + $0x1], 0  ;;  %s1722_s21 = smov 0   ;;  %s1724_s22 = smov 0  }
   0x2   :  { %s1726_s23 = smov 0   ;;  %s1728_s24 = smov 0  }
   0x3 LB: > { %s1743_s25 = sadd.s32 4294967295, %s1675_s24   ;;  %s1482_s26 = sadd.s32 4294967294, %s1675_s24   ;;  %s1675_s24 = sphi %s1728_s24, %s2370_s24   ;;  %s1671_s23 = sphi %s1726_s23, %s2369_s23   ;;  %s1667_s22 = sphi %s1724_s22, %s2368_s22   ;;  %s1663_s21 = sphi %s1722_s21, %s2367_s21  }
   0x4   : > { %s1747_s27 = sadd.s32 1, %s1675_s24   ;;  %s157_s28 = sadd.s32 1, %s1671_s23 }
   0x5   : > { %s154_s29 = ssub.s32 %s1675_s24, %s1747_s27  ;;  %p167_p0 = scmp.ne.s32.totalorder %s1671_s23, %s1667_s22 }
   0x6   : > { %p155_p1 = scmp.eq.s32.totalorder %s154_s29, 0  ;;  %p168_p2 = scmp.eq.s32.totalorder %s1743_s25, 1 }
   0x7   : > { %p173_p3 = scmp.ne.s32.totalorder %s1667_s22, %s1663_s21  ;;  %p174_p4 = scmp.eq.s32.totalorder %s1482_s26, 1 }
   0x8   : > { %s1758_s30 = scalar_select %p155_p1, %s1671_s23, %s157_s28  }
   0x9   : > { %p1760_p5 = por %p168_p2, %p167_p0  ;;  %p1764_p6 = por %p174_p4, %p173_p3 }
   0xa   : > { %p1485_p7 = scmp.ge.s32.totalorder %s1675_s24, 1  ;;  %p215_p8 = scmp.lt.s32.totalorder %s1675_s24, 3 }
   0xc   : > { %p216_p9 = pnand %p1485_p7, %p215_p8 }
   0xd   : > { %p244_p10 = scmp.lt.s32.totalorder (!%p216_p9), %s1743_s25, 1  ;;  %s1678_s18 = smov (!%p216_p9), 127  }
   0xe   : > { %219 = sbr.rel (%p216_p9) target bundleno = 952 (0x3b8), region = 44  ;;  %s1679_s29 = smov (!%p216_p9), 126  }
   0xf   : > { %s1680_s13 = smov (!%p216_p9), 112   ;;  %s1681_s19 = smov (!%p216_p9), 111  }
  0x10   : > { %s1682_s10 = smov (!%p216_p9), 110   ;;  %s2358_s16 = smov (!%p216_p9), 96  }
  0x11   : > { %s2356_s9 = smov (!%p216_p9), 95   ;;  %s2354_s17 = smov (!%p216_p9), 94  }
  0x13   : > { %v281_v0 = vld [vmem:[%s2348_s1] sm:$0xff]  ;;  %v1677_v1 = vmov 0   ;;  %s245_s11 = scalar_select %p244_p10, %s1743_s25, 1  ;;  %v282_v3 = vld [vmem:[%s2348_s1 + $0x8] sm:$0xff]  ;;  %vm276_vm0 = vcmask 1043456   ;;  %v1488_v22 = vld [vmem:[%s2348_s1 + $0x10] sm:$0xff] }
  0x14   : > { %1574 = vset.pattern.permute.xlu0 %v1677_v1  ;;  %1575 = vset.pattern.permute.xlu1 %v1677_v1  ;;  %v1489_v25 = vld [vmem:[%s2348_s1 + $0x18] sm:$0xff]  ;;  %v1490_v26 = vld [vmem:[%s2348_s1 + $0x20] sm:$0xff]  ;;  %v1491_v27 = vld [vmem:[%s2348_s1 + $0x28] sm:$0xff]  ;;  %vm316_vm1 = vcmask 1039360   ;;  %vm354_vm2 = vcmask 1031168   ;;  %vm392_vm3 = vcmask 916480  }
  0x15   : > { %285 = vperm.xlu0 %1574, %v281_v0   ;;  %1576 = vset.pattern.permute.xlu2 %v1677_v1  ;;  %s1524_s12 = sshll.u32 %s245_s11, 3  ;;  %v1492_v28 = vld [vmem:[%s2348_s1 + $0x30] sm:$0xff]  ;;  %v1493_v29 = vld [vmem:[%s2348_s1 + $0x38] sm:$0xff]  ;;  %v1494_v30 = vld [vmem:[%s2348_s1 + $0x40] sm:$0xff]  ;;  %vm430_vm4 = vcmask 908288   ;;  %vm468_vm5 = vcmask 900096  }
  0x16   : > { %s248_s15 = scalar_lea.vmem %s2347_s0, %s1524_s12  ;;  %v1495_v31 = vld [vmem:[%s2348_s1 + $0x48] sm:$0xff]  ;;  %v1496_v32 = vld [vmem:[%s2348_s1 + $0x50] sm:$0xff]  ;;  %v1497_v33 = vld [vmem:[%s2348_s1 + $0x58] sm:$0xff]  ;;  %vm506_vm6 = vcmask 785408   ;;  %vm544_vm7 = vcmask 777216   ;;  %vm582_vm8 = vcmask 769024  }
  0x17   : > { %v249_v2 = vld [vmem:[%s248_s15] sm:$0xff]  ;;  %v1499_v36 = vld [vmem:[%s2348_s1 + $0x68] sm:$0xff]  ;;  %v1500_v37 = vld [vmem:[%s2348_s1 + $0x70] sm:$0xff]  ;;  %s1686_s11 = smov 17   ;;  %vm630_vm9 = vcmask 138240   ;;  %vm1025_vm10 = vcmask 1040384   ;;  %s1423_s15 = scalar_lea.hbm %s2353_s6, %s1743_s25 }
  0x18   : > { %v252_v4 = vperm.slane %v249_v2, 0  ;;  %v258_v5 = vperm.slane %v249_v2, 1  ;;  %v264_v6 = vperm.slane %v249_v2, 2  ;;  %v270_v7 = vperm.slane %v249_v2, 3  ;;  %v1498_v34 = vld [vmem:[%s2348_s1 + $0x60] sm:$0xff]  ;;  %v1501_v41 = vld [vmem:[%s2348_s1 + $0x78] sm:$0xff] }
  0x19   : > { %v253_v10 = vperm.slane %v249_v2, 4  ;;  %v259_v11 = vperm.slane %v249_v2, 5  ;;  %v265_v14 = vperm.slane %v249_v2, 6  ;;  %v271_v15 = vperm.slane %v249_v2, 7  ;;  %v1502_v45 = vld [vmem:[%s2348_s1 + $0x80] sm:$0xff]  ;;  %v1503_v56 = vld [vmem:[%s2348_s1 + $0x88] sm:$0xff] }
  0x1a   : > { %v256_v8 = vperm.slane %v252_v4, 0  ;;  %v262_v9 = vperm.slane %v258_v5, 1  ;;  %v268_v12 = vperm.slane %v264_v6, 2  ;;  %v274_v13 = vperm.slane %v270_v7, 3  ;;  %v639_v51 = vld [vmem:[%s2349_s2] sm:$0xff]  ;;  %v640_v6 = vld [vmem:[%s2349_s2 + $0x8] sm:$0xff] }
  0x1b   : > { %v257_v18 = vperm.slane %v253_v10, 0  ;;  %v263_v19 = vperm.slane %v259_v11, 1  ;;  %v269_v20 = vperm.slane %v265_v14, 2  ;;  %v275_v21 = vperm.slane %v271_v15, 3 }
  0x1c   : > { %v1782_v16 = vsel %vm276_vm0, %v256_v8, %v262_v9  ;;  %v1787_v17 = vsel %vm276_vm0, %v268_v12, %v274_v13  ;;  %vm1028_vm11 = vcmask 1041408   ;;  %vm1031_vm12 = vcmask 1042432  }
  0x1d   : > { %290 = vperm.xlu0 %1574, %v282_v3   ;;  %308 = vrot.lane.b32.xlu1 %v1782_v16, %s1678_s18  ;;  %v1795_v23 = vsel %vm276_vm0, %v257_v18, %v263_v19  ;;  %v1798_v24 = vsel %vm276_vm0, %v269_v20, %v275_v21  ;;  %vm1145_vm13 = vcmask 1044480  }
  0x1e   : > { %312 = vrot.lane.b32.xlu2 %v1787_v17, %s1678_s18 }
  0x25   : > { %327 = vperm.xlu0 %1574, %v1488_v22   ;;  %310 = vrot.lane.b32.xlu1 %v1795_v23, %s1678_s18 }
  0x26   : > { %314 = vrot.lane.b32.xlu2 %v1798_v24, %s1678_s18 }
  0x2d   : > { %348 = vrot.lane.b32.xlu0 %v1795_v23, %s1679_s29  ;;  %332 = vperm.xlu1 %1575, %v1489_v25  }
  0x2e   : > { %346 = vrot.lane.b32.xlu2 %v1782_v16, %s1679_s29 }
  0x35   : > { %365 = vperm.xlu0 %1574, %v1490_v26   ;;  %350 = vrot.lane.b32.xlu1 %v1787_v17, %s1679_s29 }
  0x36   : > { %352 = vrot.lane.b32.xlu2 %v1798_v24, %s1679_s29 }
  0x3d   : > { %386 = vrot.lane.b32.xlu0 %v1795_v23, %s1680_s13  ;;  %370 = vperm.xlu1 %1575, %v1491_v27  }
  0x3e   : > { %384 = vrot.lane.b32.xlu2 %v1782_v16, %s1680_s13 }
  0x45   : > { %403 = vperm.xlu0 %1574, %v1492_v28   ;;  %388 = vrot.lane.b32.xlu1 %v1787_v17, %s1680_s13 }
  0x46   : > { %390 = vrot.lane.b32.xlu2 %v1798_v24, %s1680_s13 }
  0x4d   : > { %424 = vrot.lane.b32.xlu0 %v1795_v23, %s1681_s19  ;;  %408 = vperm.xlu1 %1575, %v1493_v29  }
  0x4e   : > { %422 = vrot.lane.b32.xlu2 %v1782_v16, %s1681_s19 }
  0x55   : > { %441 = vperm.xlu0 %1574, %v1494_v30   ;;  %426 = vrot.lane.b32.xlu1 %v1787_v17, %s1681_s19 }
  0x56   : > { %428 = vrot.lane.b32.xlu2 %v1798_v24, %s1681_s19 }
  0x5d   : > { %462 = vrot.lane.b32.xlu0 %v1795_v23, %s1682_s10  ;;  %446 = vperm.xlu1 %1575, %v1495_v31  }
  0x5e   : > { %460 = vrot.lane.b32.xlu2 %v1782_v16, %s1682_s10 }
  0x65   : > { %479 = vperm.xlu0 %1574, %v1496_v32   ;;  %464 = vrot.lane.b32.xlu1 %v1787_v17, %s1682_s10 }
  0x66   : > { %466 = vrot.lane.b32.xlu2 %v1798_v24, %s1682_s10 }
  0x6d   : > { %500 = vrot.lane.b32.xlu0 %v1795_v23, %s2358_s16  ;;  %484 = vperm.xlu1 %1575, %v1497_v33  }
  0x6e   : > { %498 = vrot.lane.b32.xlu2 %v1782_v16, %s2358_s16 }
  0x75   : > { %517 = vperm.xlu0 %1574, %v1498_v34   ;;  %502 = vrot.lane.b32.xlu1 %v1787_v17, %s2358_s16 }
  0x76   : > { %504 = vrot.lane.b32.xlu2 %v1798_v24, %s2358_s16  ;;  %s2364_s16 = smov 94  }
  0x78   : > { %v313_v35 = vpop.permute.xlu2 %312 }
  0x7d   : > { %538 = vrot.lane.b32.xlu0 %v1795_v23, %s2356_s9  ;;  %522 = vperm.xlu1 %1575, %v1499_v36  }
  0x7e   : > { %536 = vrot.lane.b32.xlu2 %v1782_v16, %s2356_s9 }
  0x80   : > { %v315_v38 = vpop.permute.xlu2 %314 }
  0x81   : > { %v318_v39 = vsel %vm316_vm1, %v313_v35, %v315_v38  ;;  %v324_v59 = vsel %vm316_vm1, %v315_v38, 0.0 }
  0x85   : > { %555 = vperm.xlu0 %1574, %v1500_v37   ;;  %540 = vrot.lane.b32.xlu1 %v1787_v17, %s2356_s9 }
  0x86   : > { %542 = vrot.lane.b32.xlu2 %v1798_v24, %s2356_s9 }
  0x87   : > { %v286_v40 = vpop.permute.xlu0 %285 }
  0x88   : > { %v347_v42 = vpop.permute.xlu2 %346  ;;  %v293_v52 = vmul.f32 %v286_v40, %v1782_v16  ;;  %v294_v53 = vmul.f32 %v286_v40, %v1795_v23 }
  0x8d   : > { %576 = vrot.lane.b32.xlu0 %v1795_v23, %s2354_s17  ;;  %560 = vperm.xlu1 %1575, %v1501_v41  }
  0x8e   : > { %574 = vrot.lane.b32.xlu2 %v1782_v16, %s2354_s17 }
  0x8f   : > { %v291_v43 = vpop.permute.xlu0 %290  ;;  %v309_v44 = vpop.permute.xlu1 %308 }
  0x90   : > { %v353_v46 = vpop.permute.xlu2 %352  ;;  %v295_v0 = vmul.f32 %v291_v43, %v1787_v17  ;;  %v296_v1 = vmul.f32 %v291_v43, %v1798_v24 }
  0x91   : > { %v362_v16 = vsel %vm354_vm2, %v353_v46, 0.0 }
  0x95   : > { %580 = vrot.lane.b32.xlu0 %v1798_v24, %s2354_s17  ;;  %593 = vperm.xlu1 %1575, %v1502_v45  }
  0x96   : > { %578 = vrot.lane.b32.xlu2 %v1787_v17, %s2354_s17 }
  0x97   : > { %v328_v47 = vpop.permute.xlu0 %327  ;;  %v311_v48 = vpop.permute.xlu1 %310 }
  0x98   : > { %v317_v49 = vsel %vm316_vm1, %v309_v44, %v311_v48  ;;  %v323_v50 = vsel %vm316_vm1, %v311_v48, 0.0  ;;  %v385_v62 = vpop.permute.xlu2 %384 }
  0x99   : > { %v335_v54 = vmul.f32 %v328_v47, %v317_v49  ;;  %v336_v55 = vmul.f32 %v328_v47, %v323_v50 }
  0x9b   : > { %v339_v57 = vadd.f32 %v335_v54, %v293_v52  ;;  %v340_v58 = vadd.f32 %v336_v55, %v294_v53 }
  0x9d   : > { %643 = vperm.xlu0 %1574, %v639_v51   ;;  %598 = vperm.xlu1 %1575, %v1503_v56  }
  0x9f   : > { %v349_v60 = vpop.permute.xlu0 %348  ;;  %v333_v63 = vpop.permute.xlu1 %332 }
  0xa0   : > { %v355_v61 = vsel %vm354_vm2, %v347_v42, %v349_v60  ;;  %v337_v2 = vmul.f32 %v333_v63, %v318_v39  ;;  %v338_v3 = vmul.f32 %v333_v63, %v324_v59  ;;  %v361_v7 = vsel %vm354_vm2, %v349_v60, 0.0  ;;  %v391_v15 = vpop.permute.xlu2 %390 }
  0xa1   : > { %v400_v34 = vsel %vm392_vm3, %v391_v15, 0.0 }
  0xa2   : > { %v341_v4 = vadd.f32 %v337_v2, %v295_v0  ;;  %v342_v5 = vadd.f32 %v338_v3, %v296_v1 }
  0xa5   : > { %648 = vperm.xlu1 %1575, %v640_v6  }
  0xa7   : > { %v366_v8 = vpop.permute.xlu0 %365  ;;  %v351_v11 = vpop.permute.xlu1 %350 }
  0xa8   : > { %v373_v9 = vmul.f32 %v366_v8, %v355_v61  ;;  %v374_v10 = vmul.f32 %v366_v8, %v361_v7  ;;  %v356_v14 = vsel %vm354_vm2, %v351_v11, %v353_v46  ;;  %v423_v24 = vpop.permute.xlu2 %422 }
  0xaa   : > { %v377_v12 = vadd.f32 %v373_v9, %v339_v57  ;;  %v378_v13 = vadd.f32 %v374_v10, %v340_v58 }
  0xaf   : > { %v387_v17 = vpop.permute.xlu0 %386  ;;  %v371_v19 = vpop.permute.xlu1 %370 }
  0xb0   : > { %v393_v18 = vsel %vm392_vm3, %v385_v62, %v387_v17  ;;  %v375_v20 = vmul.f32 %v371_v19, %v356_v14  ;;  %v376_v21 = vmul.f32 %v371_v19, %v362_v16  ;;  %v399_v25 = vsel %vm392_vm3, %v387_v17, 0.0  ;;  %v429_v33 = vpop.permute.xlu2 %428 }
  0xb1   : > { %v438_v10 = vsel %vm430_vm4, %v429_v33, 0.0 }
  0xb2   : > { %v379_v22 = vadd.f32 %v375_v20, %v341_v4  ;;  %v380_v23 = vadd.f32 %v376_v21, %v342_v5 }
  0xb7   : > { %v404_v26 = vpop.permute.xlu0 %403  ;;  %v389_v29 = vpop.permute.xlu1 %388 }
  0xb8   : > { %v411_v27 = vmul.f32 %v404_v26, %v393_v18  ;;  %v412_v28 = vmul.f32 %v404_v26, %v399_v25  ;;  %v394_v32 = vsel %vm392_vm3, %v389_v29, %v391_v15  ;;  %v461_v42 = vpop.permute.xlu2 %460 }
  0xba   : > { %v415_v30 = vadd.f32 %v411_v27, %v377_v12  ;;  %v416_v31 = vadd.f32 %v412_v28, %v378_v13 }
  0xbf   : > { %v425_v35 = vpop.permute.xlu0 %424  ;;  %v409_v36 = vpop.permute.xlu1 %408 }
  0xc0   : > { %v413_v37 = vmul.f32 %v409_v36, %v394_v32  ;;  %v414_v38 = vmul.f32 %v409_v36, %v400_v34  ;;  %v467_v46 = vpop.permute.xlu2 %466  ;;  %v431_v61 = vsel %vm430_vm4, %v423_v24, %v425_v35  ;;  %v437_v62 = vsel %vm430_vm4, %v425_v35, 0.0 }
  0xc1   : > { %v476_v18 = vsel %vm468_vm5, %v467_v46, 0.0 }
  0xc2   : > { %v1927_v39 = vadd.f32 %v413_v37, %v379_v22  ;;  %v1929_v40 = vadd.f32 %v414_v38, %v380_v23  ;;  %v1947_v23 = vld [vmem:[%s2352_s5] sm:$0x3] }
  0xc3   : > { %v611_v35 = vperm.slane %v1947_v23, 1  ;;  %v610_v36 = vperm.slane %v1947_v23, 0 }
  0xc7   : > { %v442_v41 = vpop.permute.xlu0 %441  ;;  %v427_v43 = vpop.permute.xlu1 %426 }
  0xc8   : > { %v499_v49 = vpop.permute.xlu2 %498  ;;  %v449_v63 = vmul.f32 %v442_v41, %v431_v61  ;;  %v450_v2 = vmul.f32 %v442_v41, %v437_v62  ;;  %v432_v17 = vsel %vm430_vm4, %v427_v43, %v429_v33 }
  0xca   : > { %v453_v9 = vadd.f32 %v449_v63, %v415_v30  ;;  %v454_v13 = vadd.f32 %v450_v2, %v416_v31 }
  0xcf   : > { %v463_v44 = vpop.permute.xlu0 %462  ;;  %v447_v45 = vpop.permute.xlu1 %446 }
  0xd0   : > { %v505_v52 = vpop.permute.xlu2 %504  ;;  %v475_v0 = vsel %vm468_vm5, %v463_v44, 0.0  ;;  %v469_v1 = vsel %vm468_vm5, %v461_v42, %v463_v44  ;;  %v451_v24 = vmul.f32 %v447_v45, %v432_v17  ;;  %v452_v25 = vmul.f32 %v447_v45, %v438_v10  ;;  %v1509_v10 = vld [vmem:[%s2349_s2 + $0x38] sm:$0xff]  ;;  %v1512_v17 = vld [vmem:[%s2349_s2 + $0x50] sm:$0xff] }
  0xd1   : > { %v514_v31 = vsel %vm506_vm6, %v505_v52, 0.0 }
  0xd2   : > { %v455_v43 = vadd.f32 %v451_v24, %v1927_v39  ;;  %v456_v44 = vadd.f32 %v452_v25, %v1929_v40 }
  0xd7   : > { %v480_v47 = vpop.permute.xlu0 %479  ;;  %v465_v48 = vpop.permute.xlu1 %464 }
  0xd8   : > { %v537_v56 = vpop.permute.xlu2 %536  ;;  %v487_v6 = vmul.f32 %v480_v47, %v469_v1  ;;  %v488_v7 = vmul.f32 %v480_v47, %v475_v0  ;;  %v470_v28 = vsel %vm468_vm5, %v465_v48, %v467_v46 }
  0xda   : > { %v491_v19 = vadd.f32 %v487_v6, %v453_v9  ;;  %v492_v20 = vadd.f32 %v488_v7, %v454_v13  ;;  %v1505_v9 = vld [vmem:[%s2349_s2 + $0x18] sm:$0xff]  ;;  %v1508_v13 = vld [vmem:[%s2349_s2 + $0x30] sm:$0xff] }
  0xdf   : > { %v501_v50 = vpop.permute.xlu0 %500  ;;  %v485_v51 = vpop.permute.xlu1 %484 }
  0xe0   : > { %v543_v60 = vpop.permute.xlu2 %542  ;;  %v513_v3 = vsel %vm506_vm6, %v501_v50, 0.0  ;;  %v507_v4 = vsel %vm506_vm6, %v499_v49, %v501_v50  ;;  %v489_v32 = vmul.f32 %v485_v51, %v470_v28  ;;  %v490_v33 = vmul.f32 %v485_v51, %v476_v18  ;;  %v1517_v18 = vld [vmem:[%s2349_s2 + $0x78] sm:$0xff] }
  0xe1   : > { %v552_v46 = vsel %vm544_vm7, %v543_v60, 0.0 }
  0xe7   : > { %v518_v53 = vpop.permute.xlu0 %517  ;;  %v503_v54 = vpop.permute.xlu1 %502 }
  0xe8   : > { %v575_v8 = vpop.permute.xlu2 %574  ;;  %v525_v14 = vmul.f32 %v518_v53, %v507_v4  ;;  %v526_v15 = vmul.f32 %v518_v53, %v513_v3  ;;  %v508_v45 = vsel %vm506_vm6, %v503_v54, %v505_v52  ;;  %v493_v53 = vadd.f32 %v489_v32, %v455_v43  ;;  %v1076_v43 = vld [vmem:[%s2350_s3 + $0x8] sm:$0xff] }
  0xea   : > { %v529_v29 = vadd.f32 %v525_v14, %v491_v19  ;;  %v530_v30 = vadd.f32 %v526_v15, %v492_v20  ;;  %v1513_v14 = vld [vmem:[%s2349_s2 + $0x58] sm:$0xff]  ;;  %v1510_v15 = vld [vmem:[%s2349_s2 + $0x40] sm:$0xff]  ;;  %v1516_v20 = vld [vmem:[%s2349_s2 + $0x70] sm:$0xff] }
  0xeb   : > { %v1514_v19 = vld [vmem:[%s2349_s2 + $0x60] sm:$0xff] }
  0xef   : > { %v539_v55 = vpop.permute.xlu0 %538  ;;  %v523_v57 = vpop.permute.xlu1 %522 }
  0xf0   : > { %v551_v11 = vsel %vm544_vm7, %v539_v55, 0.0  ;;  %v545_v12 = vsel %vm544_vm7, %v537_v56, %v539_v55  ;;  %v527_v47 = vmul.f32 %v523_v57, %v508_v45  ;;  %v528_v48 = vmul.f32 %v523_v57, %v514_v31  ;;  %v579_v51 = vpop.permute.xlu2 %578 }
  0xf1   : > { %v494_v55 = vadd.f32 %v490_v33, %v456_v44  ;;  %v1072_v44 = vld [vmem:[%s2351_s4] sm:$0xff] }
  0xf2   : > { %v531_v57 = vadd.f32 %v527_v47, %v493_v53  ;;  %v1074_v47 = vld [vmem:[%s2351_s4 + $0x10] sm:$0xf] }
  0xf3   : > { %v532_v63 = vadd.f32 %v528_v48, %v494_v55  ;;  %v1077_v48 = vld [vmem:[%s2350_s3 + $0x10] sm:$0xf] }
  0xf7   : > { %v1931_v58 = vpop.permute.xlu1 %540  ;;  %v556_v59 = vpop.permute.xlu0 %555 }
  0xf8   : > { %v563_v21 = vmul.f32 %v556_v59, %v545_v12  ;;  %v564_v22 = vmul.f32 %v556_v59, %v551_v11  ;;  %v546_v56 = vsel %vm544_vm7, %v1931_v58, %v543_v60  ;;  %v1507_v11 = vld [vmem:[%s2349_s2 + $0x28] sm:$0xff] }
  0xf9   : > { %v1511_v12 = vld [vmem:[%s2349_s2 + $0x48] sm:$0xff] }
  0xfa   : > { %v567_v37 = vadd.f32 %v563_v21, %v529_v29  ;;  %v568_v38 = vadd.f32 %v564_v22, %v530_v30  ;;  %v1518_v21 = vld [vmem:[%s2349_s2 + $0x80] sm:$0xff] }
  0xff   : > { %v561_v5 = vpop.permute.xlu1 %560  ;;  %v577_v16 = vpop.permute.xlu0 %576 }
 0x100   : > { %v589_v26 = vsel %vm582_vm8, %v577_v16, 0.0  ;;  %v583_v27 = vsel %vm582_vm8, %v575_v8, %v577_v16  ;;  %v565_v59 = vmul.f32 %v561_v5, %v546_v56  ;;  %v566_v61 = vmul.f32 %v561_v5, %v552_v46  ;;  %v1504_v5 = vld [vmem:[%s2349_s2 + $0x10] sm:$0xff]  ;;  %v1506_v8 = vld [vmem:[%s2349_s2 + $0x20] sm:$0xff]  ;;  %v1515_v16 = vld [vmem:[%s2349_s2 + $0x68] sm:$0xff] }
 0x102   : > { %v569_v58 = vadd.f32 %v565_v59, %v531_v57  ;;  %v570_v60 = vadd.f32 %v566_v61, %v532_v63 }
 0x107   : > { %v594_v34 = vpop.permute.xlu1 %593  ;;  %v581_v62 = vpop.permute.xlu0 %580 }
 0x108   : > { %v601_v41 = vmul.f32 %v594_v34, %v583_v27  ;;  %v602_v42 = vmul.f32 %v594_v34, %v589_v26  ;;  %v590_v52 = vsel %vm582_vm8, %v581_v62, 0.0  ;;  %v584_v54 = vsel %vm582_vm8, %v579_v51, %v581_v62 }
 0x10a   : > { %v605_v49 = vadd.f32 %v601_v41, %v567_v37  ;;  %v606_v50 = vadd.f32 %v602_v42, %v568_v38  ;;  %v1519_v38 = vld [vmem:[%s2349_s2 + $0x88] sm:$0xff] }
 0x10c   : > { %v1961_v39 = vmul.f32 %v611_v35, %v606_v50  ;;  %v1963_v40 = vmul.f32 %v610_v36, %v605_v49 }
 0x10e   : > { %624 = vrot.lane.b32.xlu0 %v1961_v39, %s1686_s11  ;;  %622 = vrot.lane.b32.xlu2 %v1963_v40, %s1686_s11 }
 0x10f   : > { %v599_v0 = vpop.permute.xlu1 %598  ;;  %v2024_v25 = vpop.permute.xlu0 %643 }
 0x110   : > { %v603_v1 = vmul.f32 %v599_v0, %v584_v54  ;;  %v604_v2 = vmul.f32 %v599_v0, %v590_v52 }
 0x112   : > { %v607_v3 = vadd.f32 %v603_v1, %v569_v58  ;;  %v608_v4 = vadd.f32 %v604_v2, %v570_v60 }
 0x114   : > { %v1972_v6 = vmul.f32 %v610_v36, %v607_v3  ;;  %v1974_v7 = vmul.f32 %v611_v35, %v608_v4 }
 0x116   : > { %682 = vperm.xlu0 %1574, %v1504_v5   ;;  %626 = vrot.lane.b32.xlu1 %v1972_v6, %s1686_s11 }
 0x117   : > { %628 = vrot.lane.b32.xlu2 %v1974_v7, %s1686_s11  ;;  %v2026_v26 = vpop.permute.xlu1 %648 }
 0x11e   : > { %719 = vperm.xlu0 %1574, %v1506_v8   ;;  %687 = vperm.xlu1 %1575, %v1505_v9  }
 0x126   : > { %761 = vperm.xlu0 %1574, %v1509_v10   ;;  %724 = vperm.xlu1 %1575, %v1507_v11  }
 0x12e   : > { %798 = vperm.xlu0 %1574, %v1511_v12   ;;  %756 = vperm.xlu1 %1575, %v1508_v13  }
 0x136   : > { %835 = vperm.xlu0 %1574, %v1513_v14   ;;  %793 = vperm.xlu1 %1575, %v1510_v15  }
 0x13e   : > { %872 = vperm.xlu0 %1574, %v1515_v16   ;;  %830 = vperm.xlu1 %1575, %v1512_v17  }
 0x146   : > { %909 = vperm.xlu0 %1574, %v1517_v18   ;;  %867 = vperm.xlu1 %1575, %v1514_v19   ;;  %v1075_v19 = vld [vmem:[%s2350_s3] sm:$0xff] }
 0x14e   : > { %904 = vperm.xlu1 %1575, %v1516_v20  }
 0x156   : > { %941 = vperm.xlu1 %1575, %v1518_v21  }
 0x168   : > { %v623_v22 = vpop.permute.xlu2 %622 }
 0x169   : > { %v2020_v24 = vsel %vm630_vm9, 0.0, %v623_v22 }
 0x16a   : > { %664 = vrot.lane.b32.xlu2 %v2020_v24, %s1678_s18  ;;  %v651_v1 = vmul.f32 %v2024_v25, %v2020_v24 }
 0x171   : > { %v629_v29 = vpop.permute.xlu2 %628 }
 0x180   : > { %v625_v27 = vpop.permute.xlu0 %624 }
 0x181   : > { %v2028_v28 = vsel %vm630_vm9, %v623_v22, %v625_v27 }
 0x182   : > { %666 = vrot.lane.b32.xlu0 %v2028_v28, %s1678_s18 }
 0x188   : > { %v627_v30 = vpop.permute.xlu1 %626  ;;  %v2060_v35 = vpop.permute.xlu0 %682 }
 0x189   : > { %v632_v31 = vsel %vm630_vm9, %v627_v30, %v629_v29  ;;  %v2032_v32 = vsel %vm630_vm9, 0.0, %v627_v30  ;;  %vm1299_vm9 = vcmask 1047559  }
 0x18a   : > { %668 = vrot.lane.b32.xlu1 %v2032_v32, %s1678_s18  ;;  %703 = vrot.lane.b32.xlu0 %v2028_v28, %s1679_s29  ;;  %v654_v33 = vmul.f32 %v2026_v26, %v632_v31  ;;  %v653_v14 = vmul.f32 %v2026_v26, %v2032_v32 }
 0x18b   : > { %670 = vrot.lane.b32.xlu2 %v632_v31, %s1678_s18  ;;  %s2362_s18 = smov 96  }
 0x190   : > { %v688_v34 = vpop.permute.xlu1 %687  ;;  %v2069_v37 = vpop.permute.xlu0 %719 }
 0x192   : > { %705 = vrot.lane.b32.xlu1 %v2032_v32, %s1679_s29  ;;  %740 = vrot.lane.b32.xlu0 %v2028_v28, %s1680_s13 }
 0x193   : > { %701 = vrot.lane.b32.xlu2 %v2020_v24, %s1679_s29 }
 0x198   : > { %v2067_v36 = vpop.permute.xlu1 %724  ;;  %v2084_v42 = vpop.permute.xlu0 %761 }
 0x19a   : > { %775 = vrot.lane.b32.xlu1 %v2020_v24, %s1681_s19  ;;  %744 = vrot.lane.b32.xlu0 %v632_v31, %s1680_s13 }
 0x19b   : > { %707 = vrot.lane.b32.xlu2 %v632_v31, %s1679_s29  ;;  %s2363_s29 = smov 95  }
 0x1a0   : > { %v2079_v41 = vpop.permute.xlu1 %756  ;;  %v2096_v46 = vpop.permute.xlu0 %798 }
 0x1a2   : > { %812 = vrot.lane.b32.xlu1 %v2020_v24, %s1682_s10  ;;  %781 = vrot.lane.b32.xlu0 %v632_v31, %s1681_s19 }
 0x1a3   : > { %738 = vrot.lane.b32.xlu2 %v2020_v24, %s1680_s13 }
 0x1a8   : > { %v2094_v45 = vpop.permute.xlu1 %793  ;;  %v2108_v50 = vpop.permute.xlu0 %835 }
 0x1aa   : > { %849 = vrot.lane.b32.xlu1 %v2020_v24, %s2362_s18  ;;  %818 = vrot.lane.b32.xlu0 %v632_v31, %s1682_s10 }
 0x1ab   : > { %742 = vrot.lane.b32.xlu2 %v2032_v32, %s1680_s13 }
 0x1b0   : > { %v2106_v49 = vpop.permute.xlu1 %830  ;;  %v2114_v55 = vpop.permute.xlu0 %872 }
 0x1b2   : > { %886 = vrot.lane.b32.xlu1 %v2020_v24, %s2363_s29  ;;  %855 = vrot.lane.b32.xlu0 %v632_v31, %s2362_s18 }
 0x1b3   : > { %777 = vrot.lane.b32.xlu2 %v2028_v28, %s1681_s19 }
 0x1b8   : > { %v2112_v53 = vpop.permute.xlu1 %867  ;;  %v2123_v54 = vpop.permute.xlu0 %909 }
 0x1ba   : > { %923 = vrot.lane.b32.xlu1 %v2020_v24, %s2364_s16  ;;  %892 = vrot.lane.b32.xlu0 %v632_v31, %s2363_s29 }
 0x1bb   : > { %779 = vrot.lane.b32.xlu2 %v2032_v32, %s1681_s19  ;;  %s1427_s19 = sshll.u32 %s1423_s15, 4  ;;  %s1428_s19 = int_to_ptr.hbm [resolvable:$true] %s1427_s19 }
 0x1bc   : > { %s1627_s28 = sshra.s32 %s1428_s19, 4  ;;  %s1628_s28 = int_to_ptr.hbm [resolvable:$true] %s1627_s28 }
 0x1bd   : > { %s1629_s12 = scalar_lea.hbm %s1628_s28, 1  ;;  %p1634_p0 = scmp.lt.s32.totalorder %s1628_s28, %s2353_s6 }
 0x1be   : > { %p1630_p11 = scmp.ne.s32.totalorder %s1628_s28, %s1629_s12 }
 0x1c0   : > { %v2119_v52 = vpop.permute.xlu1 %904  ;;  %p1631_p12 = pnand %p1630_p11, %p1760_p5 }
 0x1c2   : > { %946 = vperm.xlu1 %1575, %v1519_v38   ;;  %929 = vrot.lane.b32.xlu0 %v632_v31, %s2364_s16  ;;  %p1632_p13 = pneg %p1631_p12 }
 0x1c3   : > { %814 = vrot.lane.b32.xlu2 %v2028_v28, %s1682_s10 }
 0x1c4   : > { %v665_v51 = vpop.permute.xlu2 %664 }
 0x1c8   : > { %v2127_v63 = vpop.permute.xlu1 %941 }
 0x1ca   : > { %1085 = vperm.xlu1 %1575, %v1076_v43   ;;  %1101 = vperm.xlu0 %1574, %v1072_v44  }
 0x1cb   : > { %816 = vrot.lane.b32.xlu2 %v2032_v32, %s1682_s10  ;;  %s1633_s10 = scalar_lea.hbm %s2353_s6, 2 }
 0x1cc   : > { %p1635_p1 = scmp.lt.s32.totalorder %s1633_s10, %s1629_s12 }
 0x1ce   : > { %p1636_p2 = por %p1635_p1, %p1634_p0 }
 0x1d0   : > { %p1637_p3 = pnand %p1636_p2, %p1632_p13 }
 0x1d2   : > { %1111 = vperm.xlu1 %1575, %v1074_v47   ;;  %1090 = vperm.xlu0 %1574, %v1077_v48  }
 0x1d3   : > { %851 = vrot.lane.b32.xlu2 %v2028_v28, %s2362_s18 }
 0x1db   : > { %853 = vrot.lane.b32.xlu2 %v2032_v32, %s2362_s18 }
 0x1e3   : > { %888 = vrot.lane.b32.xlu2 %v2028_v28, %s2363_s29 }
 0x1e5   : > { %v671_v56 = vpop.permute.xlu2 %670 }
 0x1e6   : > { %v679_v59 = vsel %vm316_vm1, %v671_v56, 0.0 }
 0x1e7   : > { %v693_v61 = vmul.f32 %v688_v34, %v679_v59 }
 0x1e9   : > { %v697_v62 = vadd.f32 %v693_v61, %v654_v33 }
 0x1eb   : > { %890 = vrot.lane.b32.xlu2 %v2032_v32, %s2363_s29 }
 0x1ed   : > { %v702_v57 = vpop.permute.xlu2 %701 }
 0x1f3   : > { %925 = vrot.lane.b32.xlu2 %v2028_v28, %s2364_s16 }
 0x1f4   : > { %v667_v0 = vpop.permute.xlu0 %666 }
 0x1f5   : > { %v672_v58 = vsel %vm316_vm1, %v665_v51, %v667_v0  ;;  %v708_v60 = vpop.permute.xlu2 %707 }
 0x1f6   : > { %v690_v2 = vmul.f32 %v2060_v35, %v672_v58  ;;  %v716_v3 = vsel %vm354_vm2, %v708_v60, 0.0 }
 0x1f7   : > { %v730_v4 = vmul.f32 %v2067_v36, %v716_v3 }
 0x1f8   : > { %v694_v5 = vadd.f32 %v690_v2, %v651_v1 }
 0x1f9   : > { %v734_v8 = vadd.f32 %v730_v4, %v697_v62 }
 0x1fb   : > { %927 = vrot.lane.b32.xlu2 %v2032_v32, %s2364_s16  ;;  %v1073_v32 = vld [vmem:[%s2351_s4 + $0x8] sm:$0xff]  ;;  %s242_s16 = sand.u32 1, %s1667_s22  }
 0x1fc   : > { %v669_v9 = vpop.permute.xlu1 %668  ;;  %v704_v10 = vpop.permute.xlu0 %703  ;;  %s243_s20 = scalar_lea.vmem [#allocation2], %s242_s16  ;;  %s1415_s25 = scalar_lea.sflag [#allocation3], %s242_s16 }
 0x1fd   : > { %v673_v11 = vsel %vm316_vm1, %v669_v9, %v671_v56  ;;  %v709_v12 = vsel %vm354_vm2, %v702_v57, %v704_v10  ;;  %v739_v13 = vpop.permute.xlu2 %738  ;;  %s1425_s26 = sshll.u32 %s243_s20, 4  ;;  %s1426_s26 = int_to_ptr.vmem [resolvable:$true] %s1425_s26 }
 0x1fe   : > { %v692_v15 = vmul.f32 %v688_v34, %v673_v11  ;;  %v727_v16 = vmul.f32 %v2069_v37, %v709_v12 }
 0x200   : > { %v696_v17 = vadd.f32 %v692_v15, %v653_v14  ;;  %v731_v18 = vadd.f32 %v727_v16, %v694_v5 }
 0x203   : > { %1080 = vperm.xlu2 %1576, %v1075_v19  }
 0x204   : > { %v706_v20 = vpop.permute.xlu1 %705  ;;  %v741_v21 = vpop.permute.xlu0 %740 }
 0x205   : > { %v710_v22 = vsel %vm354_vm2, %v706_v20, %v708_v60  ;;  %v746_v24 = vsel %vm392_vm3, %v739_v13, %v741_v21  ;;  %v743_v27 = vpop.permute.xlu2 %742  ;;  %v715_v20 = vsel %vm354_vm2, %v704_v10, 0.0 }
 0x206   : > { %v729_v29 = vmul.f32 %v2067_v36, %v710_v22  ;;  %v764_v26 = vmul.f32 %v2079_v41, %v746_v24 }
 0x208   : > { %v733_v30 = vadd.f32 %v729_v29, %v696_v17  ;;  %v768_v31 = vadd.f32 %v764_v26, %v731_v18  ;;  %v678_v17 = vsel %vm316_vm1, %v667_v0, 0.0  ;;  %v652_v29 = vmul.f32 %v2024_v25, %v2028_v28 }
 0x209   : > { %v728_v26 = vmul.f32 %v2069_v37, %v715_v20 }
 0x20b   : > { %1106 = vperm.xlu2 %1576, %v1073_v32  }
 0x20c   : > { %v776_v33 = vpop.permute.xlu1 %775  ;;  %v745_v34 = vpop.permute.xlu0 %744 }
 0x20d   : > { %v747_v38 = vsel %vm392_vm3, %v743_v27, %v745_v34  ;;  %v778_v43 = vpop.permute.xlu2 %777  ;;  %v753_v62 = vsel %vm392_vm3, %v745_v34, 0.0  ;;  %v752_v27 = vsel %vm392_vm3, %v741_v21, 0.0 }
 0x20e   : > { %v766_v44 = vmul.f32 %v2084_v42, %v747_v38  ;;  %v767_v58 = vmul.f32 %v2084_v42, %v753_v62  ;;  %v789_v0 = vsel %vm430_vm4, %v778_v43, 0.0  ;;  %v765_v34 = vmul.f32 %v2079_v41, %v752_v27 }
 0x20f   : > { %v802_v62 = vmul.f32 %v2094_v45, %v789_v0 }
 0x210   : > { %v2154_v47 = vadd.f32 %v766_v44, %v733_v30  ;;  %v771_v9 = vadd.f32 %v767_v58, %v734_v8  ;;  %v691_v8 = vmul.f32 %v2060_v35, %v678_v17  ;;  %v783_v30 = vsel %vm430_vm4, %v776_v33, %v778_v43 }
 0x211   : > { %v801_v10 = vmul.f32 %v2094_v45, %v783_v30 }
 0x212   : > { %v695_v32 = vadd.f32 %v691_v8, %v652_v29 }
 0x214   : > { %v813_v48 = vpop.permute.xlu1 %812  ;;  %v782_v36 = vpop.permute.xlu0 %781  ;;  %v732_v21 = vadd.f32 %v728_v26, %v695_v32 }
 0x215   : > { %v780_v51 = vpop.permute.xlu2 %779  ;;  %v790_v57 = vsel %vm430_vm4, %v782_v36, 0.0 }
 0x216   : > { %v804_v3 = vmul.f32 %v2096_v46, %v790_v57  ;;  %v769_v33 = vadd.f32 %v765_v34, %v732_v21  ;;  %v805_v57 = vadd.f32 %v801_v10, %v768_v31  ;;  %v784_v58 = vsel %vm430_vm4, %v780_v51, %v782_v36 }
 0x218   : > { %v808_v12 = vadd.f32 %v804_v3, %v771_v9  ;;  %v803_v3 = vmul.f32 %v2096_v46, %v784_v58 }
 0x21c   : > { %v819_v56 = vpop.permute.xlu0 %818  ;;  %v850_v59 = vpop.permute.xlu1 %849 }
 0x21d   : > { %v815_v61 = vpop.permute.xlu2 %814  ;;  %v827_v1 = vsel %vm468_vm5, %v819_v56, 0.0 }
 0x21e   : > { %v841_v11 = vmul.f32 %v2108_v50, %v827_v1  ;;  %v820_v35 = vsel %vm468_vm5, %v813_v48, %v815_v61  ;;  %v826_v44 = vsel %vm468_vm5, %v815_v61, 0.0  ;;  %v806_v48 = vadd.f32 %v802_v62, %v769_v33 }
 0x21f   : > { %v838_v43 = vmul.f32 %v2106_v49, %v820_v35  ;;  %v839_v41 = vmul.f32 %v2106_v49, %v826_v44 }
 0x220   : > { %v845_v14 = vadd.f32 %v841_v11, %v808_v12 }
 0x221   : > { %v843_v9 = vadd.f32 %v839_v41, %v806_v48 }
 0x224   : > { %v856_v60 = vpop.permute.xlu0 %855  ;;  %v887_v4 = vpop.permute.xlu1 %886 }
 0x225   : > { %v817_v2 = vpop.permute.xlu2 %816  ;;  %v864_v5 = vsel %vm506_vm6, %v856_v60, 0.0 }
 0x226   : > { %v878_v13 = vmul.f32 %v2114_v55, %v864_v5  ;;  %v842_v5 = vadd.f32 %v838_v43, %v805_v57  ;;  %v821_v49 = vsel %vm468_vm5, %v817_v2, %v819_v56  ;;  %v807_v56 = vadd.f32 %v803_v3, %v2154_v47 }
 0x227   : > { %v840_v46 = vmul.f32 %v2108_v50, %v821_v49 }
 0x228   : > { %v882_v18 = vadd.f32 %v878_v13, %v845_v14 }
 0x22c   : > { %v893_v15 = vpop.permute.xlu0 %892  ;;  %v924_v24 = vpop.permute.xlu1 %923 }
 0x22d   : > { %v901_v16 = vsel %vm544_vm7, %v893_v15, 0.0  ;;  %v852_v42 = vpop.permute.xlu2 %851 }
 0x22e   : > { %v915_v19 = vmul.f32 %v2123_v54, %v901_v16  ;;  %v857_v25 = vsel %vm506_vm6, %v850_v59, %v852_v42  ;;  %v863_v28 = vsel %vm506_vm6, %v852_v42, 0.0 }
 0x22f   : > { %v875_v61 = vmul.f32 %v2112_v53, %v857_v25  ;;  %v876_v1 = vmul.f32 %v2112_v53, %v863_v28 }
 0x230   : > { %v919_v22 = vadd.f32 %v915_v19, %v882_v18 }
 0x231   : > { %v879_v12 = vadd.f32 %v875_v61, %v842_v5  ;;  %v880_v53 = vadd.f32 %v876_v1, %v843_v9 }
 0x234   : > { %v2182_v37 = vpop.permute.xlu0 %929  ;;  %v2189_v45 = vpop.permute.xlu1 %946 }
 0x235   : > { %v854_v38 = vpop.permute.xlu2 %853  ;;  %v938_v59 = vsel %vm582_vm8, %v2182_v37, 0.0 }
 0x236   : > { %v952_v31 = vmul.f32 %v2189_v45, %v938_v59  ;;  %v858_v16 = vsel %vm506_vm6, %v854_v38, %v856_v60 }
 0x237   : > { %v877_v2 = vmul.f32 %v2114_v55, %v858_v16 }
 0x238   : > { %v956_v18 = vadd.f32 %v952_v31, %v919_v22 }
 0x23a   : > { %v998_v20 = vsel %vm276_vm0, %v956_v18, 0.0  ;;  %v1008_v8 = vrot.slane %v956_v18, 4 }
 0x23b   : > { %v999_v60 = vrot.slane %v998_v20, 4 }
 0x23c   : > { %v1018_v50 = vsel %vm276_vm0, %v1008_v8, 0.0  ;;  %v1086_v49 = vpop.permute.xlu1 %1085 }
 0x23d   : > { %v889_v11 = vpop.permute.xlu2 %888  ;;  %v1000_v30 = vadd.f32 %v999_v60, %v998_v20  ;;  %v1019_v22 = vrot.slane %v1018_v50, 4 }
 0x23e   : > { %v894_v36 = vsel %vm544_vm7, %v887_v4, %v889_v11  ;;  %v900_v51 = vsel %vm544_vm7, %v889_v11, 0.0  ;;  %v844_v4 = vadd.f32 %v840_v46, %v807_v56 }
 0x23f   : > { %v912_v13 = vmul.f32 %v2119_v52, %v894_v36  ;;  %v913_v14 = vmul.f32 %v2119_v52, %v900_v51  ;;  %v1001_v38 = vrot.slane %v1000_v30, 2 }
 0x240   : > { %v881_v29 = vadd.f32 %v877_v2, %v844_v4 }
 0x241   : > { %v916_v42 = vadd.f32 %v912_v13, %v879_v12  ;;  %v917_v17 = vadd.f32 %v913_v14, %v880_v53  ;;  %v1002_v33 = vadd.f32 %v1001_v38, %v1000_v30  ;;  %v1095_v14 = vadd.f32 %v1086_v49, %v1972_v6 }
 0x243   : > { %v1003_v9 = vrot.slane %v1002_v33, 1 }
 0x245   : > { %v891_v19 = vpop.permute.xlu2 %890 }
 0x246   : > { %v895_v27 = vsel %vm544_vm7, %v891_v19, %v893_v15  ;;  %v1020_v15 = vadd.f32 %v1019_v22, %v1018_v50  ;;  %vm1257_vm7 = vcmask 1046530  }
 0x247   : > { %v914_v52 = vmul.f32 %v2123_v54, %v895_v27  ;;  %v1102_v27 = vpop.permute.xlu0 %1101 }
 0x249   : > { %v918_v26 = vadd.f32 %v914_v52, %v881_v29 }
 0x24d   : > { %v926_v0 = vpop.permute.xlu2 %925 }
 0x24e   : > { %v931_v47 = vsel %vm582_vm8, %v924_v24, %v926_v0  ;;  %v937_v55 = vsel %vm582_vm8, %v926_v0, 0.0  ;;  %v1021_v24 = vrot.slane %v1020_v15, 2 }
 0x24f   : > { %v949_v32 = vmul.f32 %v2127_v63, %v931_v47  ;;  %v950_v34 = vmul.f32 %v2127_v63, %v937_v55 }
 0x250   : > { %v1022_v11 = vadd.f32 %v1021_v24, %v1020_v15 }
 0x251   : > { %v953_v10 = vadd.f32 %v949_v32, %v916_v42  ;;  %v954_v35 = vadd.f32 %v950_v34, %v917_v17  ;;  %v1004_v17 = vadd.f32 %v1003_v9, %v1002_v33 }
 0x252   : > { %v1023_v2 = vrot.slane %v1022_v11, 1 }
 0x253   : > { %v957_v54 = vsel %vm276_vm0, %v953_v10, 0.0  ;;  %v964_v44 = vsel %vm276_vm0, %v954_v35, 0.0  ;;  %v973_v21 = vrot.slane %v953_v10, 4  ;;  %v974_v62 = vrot.slane %v954_v35, 4 }
 0x254   : > { %v958_v25 = vrot.slane %v957_v54, 4  ;;  %v965_v28 = vrot.slane %v964_v44, 4  ;;  %v1024_v0 = vadd.f32 %v1023_v2, %v1022_v11 }
 0x255   : > { %v977_v43 = vsel %vm276_vm0, %v973_v21, 0.0  ;;  %v984_v41 = vsel %vm276_vm0, %v974_v62, 0.0  ;;  %v928_v57 = vpop.permute.xlu2 %927 }
 0x256   : > { %v959_v63 = vadd.f32 %v958_v25, %v957_v54  ;;  %v966_v58 = vadd.f32 %v965_v28, %v964_v44  ;;  %v978_v48 = vrot.slane %v977_v43, 4  ;;  %v985_v61 = vrot.slane %v984_v41, 4 }
 0x257   : > { %v932_v1 = vsel %vm582_vm8, %v928_v57, %v2182_v37  ;;  %vm1218_vm8 = vcmask 1047557  }
 0x258   : > { %v967_v59 = vrot.slane %v966_v58, 2  ;;  %v979_v3 = vadd.f32 %v978_v48, %v977_v43  ;;  %v986_v5 = vadd.f32 %v985_v61, %v984_v41  ;;  %v951_v31 = vmul.f32 %v2189_v45, %v932_v1 }
 0x259   : > { %v960_v36 = vrot.slane %v959_v63, 2 }
 0x25a   : > { %v968_v51 = vadd.f32 %v967_v59, %v966_v58  ;;  %v980_v12 = vrot.slane %v979_v3, 2  ;;  %v987_v53 = vrot.slane %v986_v5, 2  ;;  %v955_v13 = vadd.f32 %v951_v31, %v918_v26 }
 0x25b   : > { %v961_v4 = vadd.f32 %v960_v36, %v959_v63 }
 0x25c   : > { %v969_v16 = vrot.slane %v968_v51, 1  ;;  %v981_v46 = vadd.f32 %v980_v12, %v979_v3  ;;  %v988_v42 = vadd.f32 %v987_v53, %v986_v5  ;;  %v991_v37 = vsel %vm276_vm0, %v955_v13, 0.0 }
 0x25d   : > { %v1007_v18 = vrot.slane %v955_v13, 4  ;;  %v1081_v56 = vpop.permute.xlu2 %1080  ;;  %v992_v45 = vrot.slane %v991_v37, 4  ;;  %v962_v47 = vrot.slane %v961_v4, 1 }
 0x25e   : > { %v989_v19 = vrot.slane %v988_v42, 1  ;;  %v1093_v8 = vadd.f32 %v1081_v56, %v1963_v40  ;;  %v1094_v6 = vadd.f32 %v1081_v56, %v1961_v39  ;;  %v970_v29 = vadd.f32 %v969_v16, %v968_v51 }
 0x25f   : > { %v1011_v20 = vsel %vm276_vm0, %v1007_v18, 0.0  ;;  %v982_v52 = vrot.slane %v981_v46, 1  ;;  %v993_v50 = vadd.f32 %v992_v45, %v991_v37  ;;  %v1096_v39 = vadd.f32 %v1086_v49, %v1974_v7 }
 0x260   : > { %v990_v60 = vadd.f32 %v989_v19, %v988_v42  ;;  %v1012_v26 = vrot.slane %v1011_v20, 4  ;;  %v1114_v30 = vmul.f32 %v1102_v27, %v1093_v8  ;;  %v1115_v22 = vmul.f32 %v1102_v27, %v1094_v6 }
 0x261   : > { %v994_v34 = vrot.slane %v993_v50, 2  ;;  %v983_v10 = vadd.f32 %v982_v52, %v981_v46  ;;  %v963_v33 = vadd.f32 %v962_v47, %v961_v4  ;;  %v1144_v16 = vmul.f32 0.0051020407, %v1947_v23 }
 0x262   : > { %v1013_v55 = vadd.f32 %v1012_v26, %v1011_v20  ;;  %v1027_v32 = vsel %vm1025_vm10, %v970_v29, %v990_v60  ;;  %v1120_v38 = vmul.f32 %v1114_v30, %v1114_v30  ;;  %v1121_v15 = vmul.f32 %v1115_v22, %v1115_v22 }
 0x263   : > { %v1030_v40 = vsel %vm1028_vm11, %v1027_v32, %v1004_v17  ;;  %v995_v44 = vadd.f32 %v994_v34, %v993_v50  ;;  %v1026_v59 = vsel %vm1025_vm10, %v963_v33, %v983_v10  ;;  %v2245_v2 = vperm.slane %v1144_v16, 0 }
 0x264   : > { %v1014_v35 = vrot.slane %v1013_v55, 2  ;;  %v1033_v54 = vsel %vm1031_vm12, %v1030_v40, %v1024_v0  ;;  %v1126_v21 = vsub.f32 0.0, %v1120_v38  ;;  %v1127_v62 = vsub.f32 0.0, %v1121_v15 }
 0x265   : > { %v1107_v25 = vpop.permute.xlu2 %1106  ;;  %v1521_v28 = vmul.f32 -1.442695, %v1033_v54  ;;  %v996_v57 = vrot.slane %v995_v44, 1  ;;  %v2249_v23 = vperm.slane %v1144_v16, 1 }
 0x266   : > { %v1015_v24 = vadd.f32 %v1014_v35, %v1013_v55  ;;  %v1116_v43 = vmul.f32 %v1107_v25, %v1095_v14  ;;  %v1117_v41 = vmul.f32 %v1107_v25, %v1096_v39  ;;  %v1132_v63 = vmul.f32 1.442695, %v1126_v21 }
 0x267   : > { %v1134_v58 = vmul.f32 1.442695, %v1127_v62  ;;  %1577 = vpow2.f32 %v1521_v28  ;;  %v997_v1 = vadd.f32 %v996_v57, %v995_v44 }
 0x268   : > { %v1016_v48 = vrot.slane %v1015_v24, 1  ;;  %v1122_v61 = vmul.f32 %v1116_v43, %v1116_v43  ;;  %v1123_v7 = vmul.f32 %v1117_v41, %v1117_v41  ;;  %1579 = vpow2.f32 %v1132_v63 }
 0x269   : > { %1581 = vpow2.f32 %v1134_v58  ;;  %v1029_v11 = vsel %vm1028_vm11, %v1026_v59, %v997_v1 }
 0x26a   : > { %v1017_v3 = vadd.f32 %v1016_v48, %v1015_v24  ;;  %v1128_v5 = vsub.f32 0.0, %v1122_v61  ;;  %v1129_v9 = vsub.f32 0.0, %v1123_v7 }
 0x26c   : > { %v1136_v49 = vmul.f32 1.442695, %v1128_v5  ;;  %v1138_v31 = vmul.f32 1.442695, %v1129_v9  ;;  %v1032_v36 = vsel %vm1031_vm12, %v1029_v11, %v1017_v3 }
 0x26d   : > { %v1578_v51 = vpop.eup %1577  ;;  %v1520_v12 = vmul.f32 -1.442695, %v1032_v36 }
 0x26e   : > { %1583 = vpow2.f32 %v1136_v49  ;;  %v2231_v53 = vadd.f32 1.0, %v1578_v51  ;;  %v2233_v13 = vpop.eup %1579 }
 0x26f   : > { %1585 = vpow2.f32 %v1138_v31  ;;  %v2235_v14 = vpop.eup %1581  ;;  %v1146_v46 = vsel %vm1145_vm13, %v2233_v13, 0.0  ;;  %v1184_v60 = vrot.slane %v2233_v13, 5 }
 0x270   : > { %1587 = vpow2.f32 %v1520_v12  ;;  %v1147_v42 = vrot.slane %v1146_v46, 4  ;;  %v1153_v17 = vsel %vm1145_vm13, %v2235_v14, 0.0  ;;  %v1066_v8 = vand.u32 2147483647, %v2231_v53  ;;  %v1091_v12 = vpop.permute.xlu0 %1090 }
 0x271   : > { %1589 = vrcp.f32 %v2231_v53  ;;  %v1154_v37 = vrot.slane %v1153_v17, 4  ;;  %v1068_v52 = vand.u32 2147483648, %v2231_v53  ;;  %vm1062_vm14 = vweird.f32 %v2231_v53 }
 0x272   : > { %v1148_v18 = vadd.f32 %v1147_v42, %v1146_v46  ;;  %vm2265_vm15 = vcmp.eq.f32.partialorder %v1066_v8, 8.507059e+37  ;;  %v1187_v54 = vrot.slane %v2235_v14, 5 }
 0x273   : > { %v1155_v4 = vadd.f32 %v1154_v37, %v1153_v17  ;;  %v1069_v24 = vor.u32 1.1754944e-38, %v1068_v52 }
 0x274   : > { %v2243_v56 = vpop.eup %1583  ;;  %v1149_v45 = vrot.slane %v1148_v18, 2 }
 0x275   : > { %v2247_v19 = vpop.eup %1585  ;;  %v1229_v20 = vrot.slane %v2243_v56, 2  ;;  %v1156_v27 = vrot.slane %v1155_v4, 2  ;;  %v1185_v0 = vrot.slane %v2243_v56, 5 }
 0x276   : > { %v1588_v6 = vpop.eup %1587  ;;  %v1230_v29 = vrot.slane %v2247_v19, 2  ;;  %v1150_v50 = vadd.f32 %v1149_v45, %v1148_v18  ;;  %v1188_v40 = vrot.slane %v2247_v19, 5 }
 0x277   : > { %v1590_v26 = vpop.eup %1589  ;;  %v1233_v30 = vsel %vm1145_vm13, %v1229_v20, 0.0  ;;  %v2257_v22 = vadd.f32 1.0, %v1588_v6  ;;  %v1157_v47 = vadd.f32 %v1156_v27, %v1155_v4  ;;  %v1186_v25 = vsel %vm1031_vm12, %v1184_v60, %v1185_v0  ;;  %v1112_v20 = vpop.permute.xlu1 %1111 }
 0x278   : > { %v1234_v55 = vrot.slane %v1233_v30, 4  ;;  %v1240_v32 = vsel %vm1145_vm13, %v1230_v29, 0.0  ;;  %v1058_v34 = vmul.f32 %v1590_v26, %v2231_v53  ;;  %v1151_v38 = vrot.slane %v1150_v50, 1 }
 0x279   : > { %v1241_v15 = vrot.slane %v1240_v32, 4  ;;  %1591 = vrcp.f32 %v2257_v22  ;;  %v1158_v39 = vrot.slane %v1157_v47, 1  ;;  %vm1063_vm1 = vweird.f32 %v1590_v26 }
 0x27a   : > { %v1235_v10 = vadd.f32 %v1234_v55, %v1233_v30  ;;  %v1152_v44 = vadd.f32 %v1151_v38, %v1150_v50  ;;  %v1059_v62 = vsub.f32 1.0, %v1058_v34  ;;  %v1189_v63 = vsel %vm1031_vm12, %v1187_v54, %v1188_v40  ;;  %vm1064_vm3 = vmor %vm1062_vm14, %vm1063_vm1 }
 0x27b   : > { %v1242_v21 = vadd.f32 %v1241_v15, %v1240_v32  ;;  %v1159_v28 = vadd.f32 %v1158_v39, %v1157_v47  ;;  %v1192_v61 = vsel %vm1145_vm13, %v1186_v25, 0.0  ;;  %v1199_v7 = vsel %vm1145_vm13, %v1189_v63, 0.0 }
 0x27c   : > { %v1236_v33 = vrot.slane %v1235_v10, 2  ;;  %v1160_v43 = vadd.f32 1e-05, %v1152_v44  ;;  %v1060_v57 = vmul.f32 %v1590_v26, %v1059_v62  ;;  %v1193_v5 = vrot.slane %v1192_v61, 4 }
 0x27d   : > { %v1243_v41 = vrot.slane %v1242_v21, 2  ;;  %v1161_v58 = vadd.f32 1e-05, %v1159_v28  ;;  %vm1047_vm2 = vweird.f32 %v2257_v22  ;;  %v1200_v51 = vrot.slane %v1199_v7, 4 }
 0x27e   : > { %v1237_v48 = vadd.f32 %v1236_v33, %v1235_v10  ;;  %1593 = vrcp.f32 %v1160_v43  ;;  %v1061_v3 = vadd.f32 %v1590_v26, %v1060_v57  ;;  %v1194_v36 = vadd.f32 %v1193_v5, %v1192_v61 }
 0x27f   : > { %v1592_v1 = vpop.eup %1591  ;;  %v1244_v59 = vadd.f32 %v1243_v41, %v1242_v21  ;;  %1595 = vrcp.f32 %v1161_v58  ;;  %v1053_v42 = vand.u32 2147483648, %v2257_v22  ;;  %v1201_v45 = vadd.f32 %v1200_v51, %v1199_v7 }
 0x280   : > { %v1238_v9 = vrot.slane %v1237_v48, 1  ;;  %v1043_v11 = vmul.f32 %v1592_v1, %v2257_v22  ;;  %v1065_v31 = vsel %vm1064_vm3, %v1590_v26, %v1061_v3  ;;  %v1195_v4 = vrot.slane %v1194_v36, 2 }
 0x281   : > { %v1245_v49 = vrot.slane %v1244_v59, 1  ;;  %v1070_v17 = vsel %vm2265_vm15, %v1069_v24, %v1065_v31  ;;  %vm1048_vm4 = vweird.f32 %v1592_v1  ;;  %v1051_v6 = vand.u32 2147483647, %v2257_v22 }
 0x282   : > { %v1239_v16 = vadd.f32 %v1238_v9, %v1237_v48  ;;  %v1044_v46 = vsub.f32 1.0, %v1043_v11  ;;  %v1098_v18 = vadd.f32 %v1091_v12, %v1070_v17  ;;  %v1196_v60 = vadd.f32 %v1195_v4, %v1194_v36  ;;  %vm1049_vm5 = vmor %vm1047_vm2, %vm1048_vm4 }
 0x283   : > { %v1246_v37 = vadd.f32 %v1245_v49, %v1244_v59  ;;  %v1202_v26 = vrot.slane %v1201_v45, 2  ;;  %v1054_v47 = vor.u32 1.1754944e-38, %v1053_v42  ;;  %vm1052_vm6 = vcmp.eq.f32.partialorder %v1051_v6, 8.507059e+37 }
 0x284   : > { %v1247_v8 = vadd.f32 1e-05, %v1239_v16  ;;  %v1045_v53 = vmul.f32 %v1592_v1, %v1044_v46  ;;  %v1594_v27 = vpop.eup %1593  ;;  %v1119_v52 = vmul.f32 %v1112_v20, %v1098_v18  ;;  %v1197_v34 = vrot.slane %v1196_v60, 1 }
 0x285   : > { %v1248_v29 = vadd.f32 1e-05, %v1246_v37  ;;  %v1596_v50 = vpop.eup %1595  ;;  %v1169_v30 = vmul.f32 %v1594_v27, %v2245_v2  ;;  %v1203_v40 = vadd.f32 %v1202_v26, %v1201_v45  ;;  %v1265_v26 = vrot.slane %v2243_v56, 7 }
 0x286   : > { %1597 = vrcp.f32 %v1247_v8  ;;  %v1046_v0 = vadd.f32 %v1592_v1, %v1045_v53  ;;  %v1170_v55 = vmul.f32 %v1596_v50, %v2249_v23  ;;  %v1125_v32 = vmul.f32 %v1119_v52, %v1119_v52 }
 0x287   : > { %1599 = vrcp.f32 %v1248_v29  ;;  %v1171_v38 = vperm.slane %v1169_v30, 0  ;;  %v1198_v54 = vadd.f32 %v1197_v34, %v1196_v60  ;;  %v1204_v62 = vrot.slane %v1203_v40, 1 }
 0x288   : > { %v1050_v15 = vsel %vm1049_vm5, %v1592_v1, %v1046_v0  ;;  %v1172_v39 = vperm.slane %v1170_v55, 0  ;;  %v1131_v35 = vsub.f32 0.0, %v1125_v32  ;;  %vm1412_vm12 = vcmask 155648  }
 0x289   : > { %v1055_v10 = vsel %vm1052_vm6, %v1054_v47, %v1050_v15  ;;  %v1173_v44 = vmul.f32 %v2233_v13, %v1171_v38  ;;  %v1206_v33 = vadd.f32 1e-05, %v1198_v54  ;;  %v1205_v41 = vadd.f32 %v1204_v62, %v1203_v40 }
 0x28a   : > { %v1097_v21 = vadd.f32 %v1091_v12, %v1055_v10  ;;  %v1174_v25 = vmul.f32 %v2235_v14, %v1172_v39  ;;  %v1142_v28 = vmul.f32 1.442695, %v1131_v35  ;;  %v1268_v12 = vrot.slane %v2247_v19, 7 }
 0x28b   : > { %v1175_v24 = vsel %vm1145_vm13, %v1173_v44, 0.0  ;;  %v1207_v1 = vadd.f32 1e-05, %v1205_v41 }
 0x28c   : > { %v1598_v22 = vpop.eup %1597  ;;  %v1118_v43 = vmul.f32 %v1112_v20, %v1097_v21  ;;  %v1176_v63 = vsel %vm1145_vm13, %v1174_v25, 0.0  ;;  %1601 = vpow2.f32 %v1142_v28 }
 0x28d   : > { %v1600_v57 = vpop.eup %1599  ;;  %v1251_v58 = vmul.f32 %v1598_v22, %v2245_v2  ;;  %v1177_v48 = vadd.f32 %v1176_v63, %v1175_v24  ;;  %1603 = vrcp.f32 %v1206_v33 }
 0x28e   : > { %v1252_v61 = vmul.f32 %v1600_v57, %v2249_v23  ;;  %v1124_v7 = vmul.f32 %v1118_v43, %v1118_v43  ;;  %1605 = vrcp.f32 %v1207_v1 }
 0x28f   : > { %v1253_v59 = vperm.slane %v1251_v58, 0  ;;  %1178 = vadd.xlane.f32.xlu2 %v1177_v48 }
 0x290   : > { %v1254_v3 = vperm.slane %v1252_v61, 0  ;;  %v1130_v5 = vsub.f32 0.0, %v1124_v7 }
 0x291   : > { %v1255_v9 = vmul.f32 %v2243_v56, %v1253_v59 }
 0x292   : > { %v1256_v11 = vmul.f32 %v2247_v19, %v1254_v3  ;;  %v1140_v49 = vmul.f32 1.442695, %v1130_v5  ;;  %v1602_v31 = vpop.eup %1601 }
 0x293   : > { %v1258_v36 = vsel %vm1257_vm7, %v1255_v9, 0.0  ;;  %v1269_v16 = vrot.slane %v1602_v31, 7  ;;  %v1604_v46 = vpop.eup %1603 }
 0x294   : > { %v1259_v51 = vsel %vm1257_vm7, %v1256_v11, 0.0  ;;  %1607 = vpow2.f32 %v1140_v49  ;;  %v1606_v17 = vpop.eup %1605  ;;  %v1210_v37 = vmul.f32 %v1604_v46, %v2245_v2 }
 0x295   : > { %v1260_v42 = vadd.f32 %v1259_v51, %v1258_v36  ;;  %v1270_v18 = vsel %vm1025_vm10, %v1268_v12, %v1269_v16  ;;  %v1211_v4 = vmul.f32 %v1606_v17, %v2249_v23 }
 0x296   : > { %v1280_v45 = vsel %vm1145_vm13, %v1270_v18, 0.0  ;;  %v1212_v20 = vperm.slane %v1210_v37, 0 }
 0x297   : > { %1261 = vadd.xlane.f32.xlu2 %v1260_v42  ;;  %v1281_v8 = vrot.slane %v1280_v45, 4  ;;  %v1213_v53 = vperm.slane %v1211_v4, 0 }
 0x298   : > { %v1216_v27 = vmul.f32 %v2243_v56, %v1212_v20  ;;  %v1214_v29 = vmul.f32 %v2233_v13, %v1212_v20 }
 0x299   : > { %v1282_v52 = vadd.f32 %v1281_v8, %v1280_v45  ;;  %v1217_v60 = vmul.f32 %v2247_v19, %v1213_v53  ;;  %v1215_v30 = vmul.f32 %v2235_v14, %v1213_v53 }
 0x29a   : > { %v1608_v6 = vpop.eup %1607  ;;  %v1224_v0 = vsel %vm1028_vm11, %v1216_v27, 0.0  ;;  %v1219_v47 = vsel %vm1218_vm8, %v1214_v29, 0.0 }
 0x29b   : > { %v1266_v50 = vrot.slane %v1608_v6, 7  ;;  %v1283_v55 = vrot.slane %v1282_v52, 2  ;;  %v1225_v32 = vsel %vm1028_vm11, %v1217_v60, 0.0  ;;  %v1220_v38 = vsel %vm1218_vm8, %v1215_v30, 0.0 }
 0x29c   : > { %v1226_v15 = vadd.f32 %v1225_v32, %v1224_v0  ;;  %v1221_v40 = vadd.f32 %v1220_v38, %v1219_v47 }
 0x29d   : > { %v1267_v34 = vsel %vm1025_vm10, %v1265_v26, %v1266_v50  ;;  %v1284_v39 = vadd.f32 %v1283_v55, %v1282_v52  ;;  %v1329_v55 = vlaneseq }
 0x29e   : > { %v1273_v13 = vsel %vm1145_vm13, %v1267_v34, 0.0  ;;  %1227 = vadd.xlane.f32.xlu1 %v1226_v15  ;;  %1222 = vadd.xlane.f32.xlu0 %v1221_v40 }
 0x29f   : > { %v1274_v10 = vrot.slane %v1273_v13, 4  ;;  %v1285_v35 = vrot.slane %v1284_v39, 1  ;;  %v1330_v32 = vand.u32 127, %v1329_v55  ;;  %vm1406_vm10 = vcmp.lt.s32.totalorder %v1329_v55, 10 }
 0x2a0   : > { %vm1409_vm11 = vcmp.lt.s32.totalorder %v1329_v55, 15 }
 0x2a1   : > { %v1275_v54 = vadd.f32 %v1274_v10, %v1273_v13  ;;  %v1286_v14 = vadd.f32 %v1285_v35, %v1284_v39  ;;  %v1375_v38 = vadd.s32 4294967286, %v1330_v32  ;;  %v1353_v15 = vadd.s32 4294967291, %v1330_v32 }
 0x2a2   : > { %v1398_v10 = vadd.s32 4294967281, %v1330_v32 }
 0x2a3   : > { %v1276_v44 = vrot.slane %v1275_v54, 2  ;;  %v1288_v21 = vadd.f32 1e-05, %v1286_v14 }
 0x2a5   : > { %v1277_v62 = vadd.f32 %v1276_v44, %v1275_v54  ;;  %1609 = vrcp.f32 %v1288_v21 }
 0x2a7   : > { %v1278_v25 = vrot.slane %v1277_v62, 1 }
 0x2a9   : > { %v1279_v28 = vadd.f32 %v1278_v25, %v1277_v62 }
 0x2ab   : > { %v1287_v33 = vadd.f32 1e-05, %v1279_v28  ;;  %v1610_v22 = vpop.eup %1609 }
 0x2ac   : > { %v1292_v24 = vmul.f32 %v1610_v22, %v2249_v23 }
 0x2ad   : > { %1611 = vrcp.f32 %v1287_v33 }
 0x2ae   : > { %v1294_v43 = vperm.slane %v1292_v24, 0 }
 0x2b0   : > { %v1296_v41 = vmul.f32 %v2247_v19, %v1294_v43  ;;  %v1298_v57 = vmul.f32 %v1602_v31, %v1294_v43 }
 0x2b2   : > { %v1301_v59 = vsel %vm1299_vm9, %v1296_v41, 0.0  ;;  %v1306_v5 = vsel %vm276_vm0, %v1298_v57, 0.0 }
 0x2b3   : > { %v1612_v63 = vpop.eup %1611 }
 0x2b4   : > { %v1291_v58 = vmul.f32 %v1612_v63, %v2245_v2 }
 0x2b6   : > { %v1293_v48 = vperm.slane %v1291_v58, 0 }
 0x2b8   : > { %v1295_v61 = vmul.f32 %v2243_v56, %v1293_v48  ;;  %v1297_v7 = vmul.f32 %v1608_v6, %v1293_v48 }
 0x2ba   : > { %v1300_v1 = vsel %vm1299_vm9, %v1295_v61, 0.0  ;;  %v1305_v3 = vsel %vm276_vm0, %v1297_v7, 0.0  ;;  %vm1403_vm0 = vcmp.lt.s32.totalorder %v1329_v55, 5 }
 0x2bb   : > { %v1302_v9 = vadd.f32 %v1301_v59, %v1300_v1  ;;  %v1307_v23 = vadd.f32 %v1306_v5, %v1305_v3 }
 0x2bd   : > { %1303 = vadd.xlane.f32.xlu2 %v1302_v9  ;;  %1308 = vadd.xlane.f32.xlu0 %v1307_v23 }
 0x302   : > { %v1179_v19 = vpop.xlane.xlu2 %1178 }
 0x303   : > { %v1311_v11 = vperm.slane %v1179_v19, 0  ;;  %v1312_v49 = vperm.slane %v1179_v19, 1  ;;  %v1313_v31 = vperm.slane %v1179_v19, 2  ;;  %v1314_v2 = vperm.slane %v1179_v19, 3 }
 0x304   : > { %v1315_v36 = vperm.slane %v1179_v19, 4 }
 0x305   : > { %1316 = vst [vmem:[#allocation1] ss:$9 sm:$0xff] %v1311_v11 }
 0x306   : > { %1318 = vst [vmem:[#allocation1 + $0x1] ss:$9 sm:$0xff] %v1312_v49 }
 0x307   : > { %1320 = vst [vmem:[#allocation1 + $0x2] ss:$9 sm:$0xff] %v1313_v31 }
 0x308   : > { %1322 = vst [vmem:[#allocation1 + $0x3] ss:$9 sm:$0xff] %v1314_v2 }
 0x309   : > { %1324 = vst [vmem:[#allocation1 + $0x4] ss:$9 sm:$0xff] %v1315_v36 }
 0x30a   : > { %v1262_v18 = vpop.xlane.xlu2 %1261 }
 0x30b   : > { %v1357_v4 = vperm.slane %v1262_v18, 2  ;;  %v1358_v45 = vperm.slane %v1262_v18, 3  ;;  %v1359_v8 = vperm.slane %v1262_v18, 4  ;;  %v1360_v53 = vperm.slane %v1262_v18, 5 }
 0x30c   : > { %v1361_v6 = vperm.slane %v1262_v18, 6 }
 0x310   : > { %v1325_v56 = vld [vmem:[#allocation1] sm:$0xff] }
 0x311   : > { %1327 = vperm.xlu1 %1575, %v1325_v56   ;;  %v1228_v51 = vpop.xlane.xlu1 %1227  ;;  %v1223_v12 = vpop.xlane.xlu0 %1222 }
 0x312   : > { %v1338_v16 = vperm.slane %v1228_v51, 0  ;;  %v1339_v46 = vperm.slane %v1228_v51, 1  ;;  %v1335_v42 = vperm.slane %v1223_v12, 5  ;;  %v1336_v17 = vperm.slane %v1223_v12, 6 }
 0x313   : > { %v1337_v37 = vperm.slane %v1223_v12, 7 }
 0x314   : > { %1346 = vst [vmem:[#allocation1 + $0x3] ss:$9 sm:$0xff] %v1338_v16 }
 0x315   : > { %1348 = vst [vmem:[#allocation1 + $0x4] ss:$9 sm:$0xff] %v1339_v46 }
 0x316   : > { %1340 = vst [vmem:[#allocation1] ss:$9 sm:$0xff] %v1335_v42 }
 0x317   : > { %1342 = vst [vmem:[#allocation1 + $0x1] ss:$9 sm:$0xff] %v1336_v17 }
 0x318   : > { %1344 = vst [vmem:[#allocation1 + $0x2] ss:$9 sm:$0xff] %v1337_v37 }
 0x31f   : > { %v1349_v20 = vld [vmem:[#allocation1] sm:$0xff] }
 0x320   : > { %1362 = vst [vmem:[#allocation1] ss:$9 sm:$0xff] %v1357_v4  ;;  %1351 = vperm.xlu2 %1576, %v1349_v20  }
 0x321   : > { %1364 = vst [vmem:[#allocation1 + $0x1] ss:$9 sm:$0xff] %v1358_v45 }
 0x322   : > { %1366 = vst [vmem:[#allocation1 + $0x2] ss:$9 sm:$0xff] %v1359_v8 }
 0x323   : > { %1368 = vst [vmem:[#allocation1 + $0x3] ss:$9 sm:$0xff] %v1360_v53 }
 0x324   : > { %1370 = vst [vmem:[#allocation1 + $0x4] ss:$9 sm:$0xff] %v1361_v6 }
 0x32b   : > { %v1371_v27 = vld [vmem:[#allocation1] sm:$0xff] }
 0x32c   : > { %1373 = vperm.xlu0 %1574, %v1371_v27  }
 0x330   : > { %v1309_v29 = vpop.xlane.xlu0 %1308  ;;  %v1304_v52 = vpop.xlane.xlu2 %1303 }
 0x331   : > { %v1381_v60 = vperm.slane %v1309_v29, 0  ;;  %v1382_v26 = vperm.slane %v1309_v29, 1  ;;  %v1383_v50 = vperm.slane %v1309_v29, 2  ;;  %v1384_v30 = vperm.slane %v1309_v29, 3 }
 0x332   : > { %v1380_v0 = vperm.slane %v1304_v52, 7 }
 0x333   : > { %1387 = vst [vmem:[#allocation1 + $0x1] ss:$9 sm:$0xff] %v1381_v60 }
 0x334   : > { %1389 = vst [vmem:[#allocation1 + $0x2] ss:$9 sm:$0xff] %v1382_v26 }
 0x335   : > { %1391 = vst [vmem:[#allocation1 + $0x3] ss:$9 sm:$0xff] %v1383_v50 }
 0x336   : > { %1393 = vst [vmem:[#allocation1 + $0x4] ss:$9 sm:$0xff] %v1384_v30 }
 0x337   : > { %1385 = vst [vmem:[#allocation1] ss:$9 sm:$0xff] %v1380_v0 }
 0x33e   : > { %v1394_v47 = vld [vmem:[#allocation1] sm:$0xff] }
 0x33f   : > { %1396 = vperm.xlu1 %1575, %v1394_v47  }
 0x37a   : > { %v1352_v13 = vpop.permute.xlu2 %1351 }
 0x37b   : > { %v1354_v54 = vperm.slane %v1352_v13, %v1353_v15 }
 0x383   : > { %v1328_v34 = vpop.permute.xlu1 %1327 }
 0x384   : > { %v1331_v39 = vperm.slane %v1328_v34, %v1330_v32 }
 0x386   : > { %v1405_v44 = vsel %vm1403_vm0, %v1331_v39, %v1354_v54 }
 0x39e   : > { %v1374_v40 = vpop.permute.xlu0 %1373 }
 0x39f   : > { %v1376_v35 = vperm.slane %v1374_v40, %v1375_v38 }
 0x3a1   : > { %v1408_v62 = vsel %vm1406_vm10, %v1405_v44, %v1376_v35 }
 0x3b1   : > { %v1397_v14 = vpop.permute.xlu1 %1396 }
 0x3b2   : > { %v1399_v21 = vperm.slane %v1397_v14, %v1398_v10 }
 0x3b4   : > { %v1411_v25 = vsel %vm1409_vm11, %v1408_v62, %v1399_v21 }
 0x3b5   : > { %1413 = vst.msk [vmem:[%s243_s20] sm:$0x1] %vm1412_vm12, %v1411_v25 }
 0x3b6   : > { %1640 = shalt.err (!%p1637_p3)
}
 0x3b7   : > { %1525 = dma.vmem_to_hbm [thread:$0]  (%p1760_p5), %s1426_s26, 16, %s1428_s19, %s1415_s25  }
 0x3b8 PF: > { %p1531_p4 = scmp.ge.s32.totalorder %s1675_s24, 2  ;;  %s1439_s29 = sand.u32 1, %s1663_s21  }
 0x3b9   : > { %s1440_s16 = scalar_lea.sflag [#allocation3], %s1439_s29 }
 0x3ba   : > { %p1528_p7 = pnand %p1531_p4, %p1764_p6 }
 0x3bc   : > { %p1529_p8 = pneg %p1528_p7 }
 0x3be   : > { %1658 = dma.done.wait (%p1529_p8), %s1440_s16, 16  }
 0x3bf   : > { %1660 = vsyncadd (%p1529_p8), %s1440_s16, 4294967280  ;;  %p16_p9 = scmp.ge.s32.totalorder %s1747_s27, 4   ;;  %s2367_s21 = smov %s1667_s22 }
 0x3c0   : > { %s2368_s22 = smov %s1671_s23  ;;  %s2369_s23 = smov %s1758_s30 }
 0x3c1   : > { %s2370_s24 = smov %s1747_s27  ;;  %18 = sbr.rel (!%p16_p9) target bundleno = 3 (0x3), region = 111 }
 0x3c6   :  { %1445 = vsyncpa [#allocation3], 1 }
 0x3c7   :  { %1447 = vsyncpa [#allocation3 + $0x1], 1 }

</bundles_post_ra>
